<compile_context>
chip_gen: v6e
topology: v6e:2x2x1
jax: 0.10.0
libtpu: 0.0.40
codegen_flags: <defaults>
</compile_context>

<pallas_src>
import functools

import jax
import jax.numpy as jnp
from jax.experimental import pallas as pl
from jax.experimental.pallas import tpu as pltpu

LN_EPS = 1e-5


# ----------------------------- in-kernel helpers -----------------------------

def _erf(x):
    # Abramowitz & Stegun 7.1.26 rational approximation, |err| < 1.5e-7
    # (float32 precision), built from ops that always lower on Mosaic.
    a1, a2, a3, a4, a5 = (0.254829592, -0.284496736, 1.421413741,
                          -1.453152027, 1.061405429)
    p = 0.3275911
    sgn = jnp.where(x >= 0.0, 1.0, -1.0)
    ax = jnp.abs(x)
    t = 1.0 / (1.0 + p * ax)
    poly = ((((a5 * t + a4) * t + a3) * t + a2) * t + a1) * t
    return sgn * (1.0 - poly * jnp.exp(-ax * ax))


def _gelu_exact(x):
    # nn.GELU() default: 0.5 * x * (1 + erf(x / sqrt(2)))
    return 0.5 * x * (1.0 + _erf(x * (2.0 ** -0.5)))


def _layernorm(x, g, b):
    mu = jnp.mean(x, axis=-1, keepdims=True)
    xc = x - mu
    var = jnp.mean(xc * xc, axis=-1, keepdims=True)
    return xc * jax.lax.rsqrt(var + LN_EPS) * g + b


# ------------------------------ fused Pallas kernel ---------------------------

def _graphormer_kernel(n_layers, num_heads, head_dim, n_node,
                       x_ref, bias_ref,
                       atom_w_ref, atom_b_ref, gtok_ref,
                       ln1g_ref, ln1b_ref, wqkv_ref, bqkv_ref,
                       wo_ref, bo_ref, ln2g_ref, ln2b_ref,
                       w1_ref, b1_ref, w2_ref, b2_ref,
                       fing_ref, finb_ref,
                       o_ref, ctx_ref):
    l = pl.program_id(1)                    # layer index (sequential axis)
    hidden = num_heads * head_dim
    seq = n_node + 1

    # ---- l == 0: atom encoder + graph-token prepend (activation init) -------
    @pl.when(l == 0)
    def _():
        nf = (jnp.dot(x_ref[0], atom_w_ref[...],
                      preferred_element_type=jnp.float32) + atom_b_ref[...])
        o_ref[0, 0:1, :] = gtok_ref[...]          # graph token row
        o_ref[0, 1:seq, :] = nf                   # node features

    x = o_ref[0]                                  # (S, H) resident across layers

    # ---- self-attention block ----
    y = _layernorm(x, ln1g_ref[0], ln1b_ref[0])
    qkv = (jnp.dot(y, wqkv_ref[0], preferred_element_type=jnp.float32)
           + bqkv_ref[0])                                         # (S, 3H)
    q = qkv[:, 0 * hidden:1 * hidden] * (head_dim ** -0.5)
    k = qkv[:, 1 * hidden:2 * hidden]
    v = qkv[:, 2 * hidden:3 * hidden]

    for h in range(num_heads):                    # static unroll (tiny heads)
        sl = slice(h * head_dim, (h + 1) * head_dim)
        s = jax.lax.dot_general(q[:, sl], k[:, sl],
                                (((1,), (1,)), ((), ())),
                                preferred_element_type=jnp.float32)   # (S, S)
        s = s + bias_ref[0, h]
        s = s - jnp.max(s, axis=-1, keepdims=True)
        p = jnp.exp(s)
        p = p * pl.reciprocal(jnp.sum(p, axis=-1, keepdims=True), approx=True)
        # all heads land in one (S, H) scratch -> single matmul with Wo below
        ctx_ref[:, sl] = jnp.dot(p, v[:, sl],
                                 preferred_element_type=jnp.float32)

    attn = (jnp.dot(ctx_ref[...], wo_ref[0],
                    preferred_element_type=jnp.float32) + bo_ref[0])
    x = x + attn                                  # residual

    # ---- feed-forward block ----
    y = _layernorm(x, ln2g_ref[0], ln2b_ref[0])
    h1 = jnp.dot(y, w1_ref[0], preferred_element_type=jnp.float32) + b1_ref[0]
    h1 = _gelu_exact(h1)
    x = x + (jnp.dot(h1, w2_ref[0], preferred_element_type=jnp.float32)
             + b2_ref[0])                         # residual

    # ---- carry to next layer, or finalize with the last LayerNorm ----
    @pl.when(l < n_layers - 1)
    def _():
        o_ref[0] = x

    @pl.when(l == n_layers - 1)
    def _():
        o_ref[0] = _layernorm(x, fing_ref[...], finb_ref[...])


def _fused_forward(x, gab, params):
    B, N, F = x.shape
    S = N + 1
    H = params["atom_w"].shape[1]
    lyr = params["layers"]
    L = lyr["wqkv"].shape[0]
    num_heads = gab.shape[1]
    head_dim = H // num_heads

    kernel = functools.partial(_graphormer_kernel, L, num_heads, head_dim, N)

    def const_spec(a):
        nd = a.ndim
        return pl.BlockSpec(a.shape, lambda b, l, _nd=nd: (0,) * _nd)

    def layer_spec(a):
        return pl.BlockSpec((1,) + a.shape[1:], lambda b, l: (l, 0, 0))

    in_specs = [
        pl.BlockSpec((1, N, F), lambda b, l: (b, 0, 0)),                # x nodes
        pl.BlockSpec((1, num_heads, S, S), lambda b, l: (b, 0, 0, 0)),  # bias
        const_spec(params["atom_w"]),
        const_spec(params["atom_b"]),
        const_spec(params["graph_token"]),
        layer_spec(lyr["ln1_g"]), layer_spec(lyr["ln1_b"]),
        layer_spec(lyr["wqkv"]), layer_spec(lyr["bqkv"]),
        layer_spec(lyr["wo"]), layer_spec(lyr["bo"]),
        layer_spec(lyr["ln2_g"]), layer_spec(lyr["ln2_b"]),
        layer_spec(lyr["w1"]), layer_spec(lyr["b1"]),
        layer_spec(lyr["w2"]), layer_spec(lyr["b2"]),
        const_spec(params["final_g"]),
        const_spec(params["final_b"]),
    ]

    return pl.pallas_call(
        kernel,
        out_shape=jax.ShapeDtypeStruct((B, S, H), jnp.float32),
        grid=(B, L),
        in_specs=in_specs,
        out_specs=pl.BlockSpec((1, S, H), lambda b, l: (b, 0, 0)),
        scratch_shapes=[pltpu.VMEM((S, H), jnp.float32)],   # per-head context
        compiler_params=pltpu.CompilerParams(
            dimension_semantics=("parallel", "arbitrary"),
            vmem_limit_bytes=32 * 1024 * 1024),
    )(x, gab, params["atom_w"], params["atom_b"], params["graph_token"],
      lyr["ln1_g"], lyr["ln1_b"], lyr["wqkv"], lyr["bqkv"],
      lyr["wo"], lyr["bo"], lyr["ln2_g"], lyr["ln2_b"],
      lyr["w1"], lyr["b1"], lyr["w2"], lyr["b2"],
      params["final_g"], params["final_b"])


# ------------------------------ parameter init --------------------------------

def init_params(key, n_layers, num_node_feat, num_heads, hidden_dim, ffn_dim):
    def nxt():
        nonlocal key
        key, sub = jax.random.split(key)
        return sub

    def w(shape, scale=0.05):
        return (scale * jax.random.normal(nxt(), shape)).astype(jnp.float32)

    L, H, Ff = n_layers, hidden_dim, ffn_dim
    params = {
        "atom_w": w((num_node_feat, H)),
        "atom_b": jnp.zeros((1, H), jnp.float32),
        # nn.Embedding(40, num_heads, padding_idx=0): row 0 is zeros
        "len_sp_emb": w((40, num_heads)).at[0].set(0.0),
        "graph_token": w((1, H)),
        "graph_token_vd": w((1, num_heads)),
        "final_g": jnp.ones((1, H), jnp.float32),
        "final_b": jnp.zeros((1, H), jnp.float32),
        # per-layer params stacked along a leading L axis (streamed per layer)
        "layers": {
            "ln1_g": jnp.ones((L, 1, H), jnp.float32),
            "ln1_b": jnp.zeros((L, 1, H), jnp.float32),
            "wqkv": w((L, H, 3 * H)),              # [Wq | Wk | Wv] fused
            "bqkv": jnp.zeros((L, 1, 3 * H), jnp.float32),
            "wo": w((L, H, H)),
            "bo": jnp.zeros((L, 1, H), jnp.float32),
            "ln2_g": jnp.ones((L, 1, H), jnp.float32),
            "ln2_b": jnp.zeros((L, 1, H), jnp.float32),
            "w1": w((L, H, Ff)),
            "b1": jnp.zeros((L, 1, Ff), jnp.float32),
            "w2": w((L, Ff, H)),
            "b2": jnp.zeros((L, 1, H), jnp.float32),
        },
    }
    return params


# ------------------------------ Graphormer forward -----------------------------

def _assemble_graph_attn_bias(params, attn_bias, len_shortest_path, num_heads):
    """Matches the PyTorch bias-assembly glue (embedding gathers + scatters)."""
    B, S, _ = attn_bias.shape
    lsp = jnp.clip(len_shortest_path, 0, 39).astype(jnp.int32)
    gab = jnp.broadcast_to(attn_bias[:, None, :, :], (B, num_heads, S, S))
    spatial_pos_bias = jnp.transpose(params["len_sp_emb"][lsp], (0, 3, 1, 2))
    gab = gab.at[:, :, 1:, 1:].add(spatial_pos_bias)
    t = params["graph_token_vd"].reshape(1, num_heads, 1)
    gab = gab.at[:, :, 1:, 0].add(t)
    gab = gab.at[:, :, 0, :].add(t)
    # NOTE: attn_bias is intentionally added twice, matching the reference.
    return (gab + attn_bias[:, None, :, :]).astype(jnp.float32)


@functools.partial(jax.jit, static_argnames=("num_heads",))
def graphormer_forward(params, x, attn_bias, len_shortest_path, num_heads):
    """x: (B, N, F) f32; attn_bias: (B, N+1, N+1) f32;
    len_shortest_path: (B, N, N) int32.  Returns (B, N+1, H) f32."""
    gab = _assemble_graph_attn_bias(params, attn_bias, len_shortest_path,
                                    num_heads)
    # input_dropout / attention / residual / ffn dropouts: identity (eval mode)
    return _fused_forward(x, gab, params)


# --------------------------- pure-JAX reference (check) ------------------------

def _reference_forward(params, x, attn_bias, len_shortest_path, num_heads):
    B, N, _ = x.shape
    S = N + 1
    H = params["atom_w"].shape[1]
    dk = H // num_heads
    gab = _assemble_graph_attn_bias(params, attn_bias, len_shortest_path,
                                    num_heads)

    def ln(v, g, b):
        mu = jnp.mean(v, axis=-1, keepdims=True)
        var = jnp.mean((v - mu) ** 2, axis=-1, keepdims=True)
        return (v - mu) / jnp.sqrt(var + LN_EPS) * g + b

    nf = x @ params["atom_w"] + params["atom_b"]
    gt = jnp.broadcast_to(params["graph_token"][None], (B, 1, H))
    h = jnp.concatenate([gt, nf], axis=1)

    lyr = params["layers"]
    for l in range(lyr["wqkv"].shape[0]):
        y = ln(h, lyr["ln1_g"][l], lyr["ln1_b"][l])
        qkv = y @ lyr["wqkv"][l] + lyr["bqkv"][l]
        q, k, v = jnp.split(qkv, 3, axis=-1)
        q = q * (dk ** -0.5)
        qh = q.reshape(B, S, num_heads, dk).transpose(0, 2, 1, 3)
        kh = k.reshape(B, S, num_heads, dk).transpose(0, 2, 1, 3)
        vh = v.reshape(B, S, num_heads, dk).transpose(0, 2, 1, 3)
        s = jnp.einsum("bhqd,bhkd->bhqk", qh, kh) + gab
        p = jax.nn.softmax(s, axis=-1)
        ctx = jnp.einsum("bhqk,bhkd->bhqd", p, vh)
        ctx = ctx.transpose(0, 2, 1, 3).reshape(B, S, H)
        h = h + (ctx @ lyr["wo"][l] + lyr["bo"][l])
        y = ln(h, lyr["ln2_g"][l], lyr["ln2_b"][l])
        h1 = y @ lyr["w1"][l] + lyr["b1"][l]
        h1 = 0.5 * h1 * (1.0 + jax.lax.erf(h1 * (2.0 ** -0.5)))
        h = h + (h1 @ lyr["w2"][l] + lyr["b2"][l])

    return ln(h, params["final_g"], params["final_b"])


# ------------------------------------ main -------------------------------------

if __name__ == "__main__":
    n_layers = 2
    num_node_feat = 9
    num_heads = 4
    hidden_dim = 32
    ffn_dim = 64
    B, N = 2, 7            # seq length inside the transformer = N + 1 = 8

    key = jax.random.PRNGKey(0)
    k_params, k_x, k_bias, k_sp = jax.random.split(key, 4)

    params = init_params(k_params, n_layers, num_node_feat, num_heads,
                         hidden_dim, ffn_dim)

    x = jax.random.normal(k_x, (B, N, num_node_feat), dtype=jnp.float32)
    attn_bias = 0.1 * jax.random.normal(k_bias, (B, N + 1, N + 1),
                                        dtype=jnp.float32)
    len_shortest_path = jax.random.randint(k_sp, (B, N, N), 0, 40,
                                           dtype=jnp.int32)

    out = graphormer_forward(params, x, attn_bias, len_shortest_path,
                             num_heads=num_heads)
    out = jax.block_until_ready(out)
    assert out.shape == (B, N + 1, hidden_dim)
    assert bool(jnp.all(jnp.isfinite(out)))

    # correctness check vs. pure-JAX reference (erf/reciprocal approximations
    # in-kernel -> loose tolerance)
    ref = _reference_forward(params, x, attn_bias, len_shortest_path, num_heads)
    max_err = float(jnp.max(jnp.abs(out - ref)))
    assert max_err < 2e-2, f"max abs error vs reference: {max_err}"

    print("KERNEL_OK")
</pallas_src>

<mosaic_0001>
module attributes {stable_mosaic.version = 11 : i64} {
  func.func @_graphormer_kernel(%arg0: i32, %arg1: i32, %arg2: memref<1x7x9xf32, #tpu.memory_space<vmem>>, %arg3: memref<1x4x8x8xf32, #tpu.memory_space<vmem>>, %arg4: memref<9x32xf32, #tpu.memory_space<vmem>>, %arg5: memref<1x32xf32, #tpu.memory_space<vmem>>, %arg6: memref<1x32xf32, #tpu.memory_space<vmem>>, %arg7: memref<1x1x32xf32, #tpu.memory_space<vmem>>, %arg8: memref<1x1x32xf32, #tpu.memory_space<vmem>>, %arg9: memref<1x32x96xf32, #tpu.memory_space<vmem>>, %arg10: memref<1x1x96xf32, #tpu.memory_space<vmem>>, %arg11: memref<1x32x32xf32, #tpu.memory_space<vmem>>, %arg12: memref<1x1x32xf32, #tpu.memory_space<vmem>>, %arg13: memref<1x1x32xf32, #tpu.memory_space<vmem>>, %arg14: memref<1x1x32xf32, #tpu.memory_space<vmem>>, %arg15: memref<1x32x64xf32, #tpu.memory_space<vmem>>, %arg16: memref<1x1x64xf32, #tpu.memory_space<vmem>>, %arg17: memref<1x64x32xf32, #tpu.memory_space<vmem>>, %arg18: memref<1x1x32xf32, #tpu.memory_space<vmem>>, %arg19: memref<1x32xf32, #tpu.memory_space<vmem>>, %arg20: memref<1x32xf32, #tpu.memory_space<vmem>>, %arg21: memref<1x8x32xf32, #tpu.memory_space<vmem>>, %arg22: memref<8x32xf32, #tpu.memory_space<vmem>>) attributes {dimension_semantics = [#tpu.dimension_semantics<parallel>, #tpu.dimension_semantics<arbitrary>], iteration_bounds = array<i64: 2, 2>, scalar_prefetch = 0 : i64, scratch_operands = 1 : i64, tpu.core_type = #tpu.core_type<tc>, window_params = [{transform_indices = @transform_0, window_bounds = array<i64: 1, 7, 9>}, {transform_indices = @transform_1, window_bounds = array<i64: 1, 4, 8, 8>}, {pipeline_mode = #tpu.pipeline_mode<synchronous>, transform_indices = @transform_2, window_bounds = array<i64: 9, 32>}, {pipeline_mode = #tpu.pipeline_mode<synchronous>, transform_indices = @transform_3, window_bounds = array<i64: 1, 32>}, {pipeline_mode = #tpu.pipeline_mode<synchronous>, transform_indices = @transform_4, window_bounds = array<i64: 1, 32>}, {transform_indices = @transform_5, window_bounds = array<i64: 1, 1, 32>}, {transform_indices = @transform_6, window_bounds = array<i64: 1, 1, 32>}, {transform_indices = @transform_7, window_bounds = array<i64: 1, 32, 96>}, {transform_indices = @transform_8, window_bounds = array<i64: 1, 1, 96>}, {transform_indices = @transform_9, window_bounds = array<i64: 1, 32, 32>}, {transform_indices = @transform_10, window_bounds = array<i64: 1, 1, 32>}, {transform_indices = @transform_11, window_bounds = array<i64: 1, 1, 32>}, {transform_indices = @transform_12, window_bounds = array<i64: 1, 1, 32>}, {transform_indices = @transform_13, window_bounds = array<i64: 1, 32, 64>}, {transform_indices = @transform_14, window_bounds = array<i64: 1, 1, 64>}, {transform_indices = @transform_15, window_bounds = array<i64: 1, 64, 32>}, {transform_indices = @transform_16, window_bounds = array<i64: 1, 1, 32>}, {pipeline_mode = #tpu.pipeline_mode<synchronous>, transform_indices = @transform_17, window_bounds = array<i64: 1, 32>}, {pipeline_mode = #tpu.pipeline_mode<synchronous>, transform_indices = @transform_18, window_bounds = array<i64: 1, 32>}, {transform_indices = @transform_19, window_bounds = array<i64: 1, 8, 32>}]} {
    %c0_i32 = arith.constant 0 : i32
    %0 = arith.cmpi eq, %arg1, %c0_i32 : i32
    %1 = arith.extui %0 : i1 to i32
    %c0_i32_0 = arith.constant 0 : i32
    %2 = arith.cmpi ne, %1, %c0_i32_0 : i32
    scf.if %2 {
      %c0_108 = arith.constant 0 : index
      %c0_109 = arith.constant 0 : index
      %c0_110 = arith.constant 0 : index
      %212 = vector.load %arg2[%c0_108, %c0_109, %c0_110] : memref<1x7x9xf32, #tpu.memory_space<vmem>>, vector<1x7x9xf32>
      %213 = vector.shape_cast %212 : vector<1x7x9xf32> to vector<7x9xf32>
      %c0_111 = arith.constant 0 : index
      %c0_112 = arith.constant 0 : index
      %214 = vector.load %arg4[%c0_111, %c0_112] : memref<9x32xf32, #tpu.memory_space<vmem>>, vector<9x32xf32>
      %cst_113 = arith.constant dense<0.000000e+00> : vector<7x32xf32>
      %215 = tpu.matmul %213, %214, %cst_113 {dimension_numbers = #tpu.dot_dimension_numbers<[1], [0], [0], [1], [0, 0, 1, 1], [], []>} : vector<7x9xf32>, vector<9x32xf32>, vector<7x32xf32> -> vector<7x32xf32>
      %c0_114 = arith.constant 0 : index
      %c0_115 = arith.constant 0 : index
      %216 = vector.load %arg5[%c0_114, %c0_115] : memref<1x32xf32, #tpu.memory_space<vmem>>, vector<1x32xf32>
      %217 = vector.broadcast %216 : vector<1x32xf32> to vector<7x32xf32>
      %218 = arith.addf %215, %217 : vector<7x32xf32>
      %c0_116 = arith.constant 0 : index
      %c0_117 = arith.constant 0 : index
      %219 = vector.load %arg6[%c0_116, %c0_117] : memref<1x32xf32, #tpu.memory_space<vmem>>, vector<1x32xf32>
      %c0_118 = arith.constant 0 : index
      %c0_119 = arith.constant 0 : index
      %c0_120 = arith.constant 0 : index
      %220 = vector.load %arg21[%c0_118, %c0_119, %c0_120] : memref<1x8x32xf32, #tpu.memory_space<vmem>>, vector<1x1x32xf32>
      %221 = vector.shape_cast %220 : vector<1x1x32xf32> to vector<1x32xf32>
      %222 = vector.shape_cast %219 : vector<1x32xf32> to vector<1x1x32xf32>
      tpu.vector_store %arg21[%c0_118, %c0_119, %c0_120], %222 {strides = array<i32>} : memref<1x8x32xf32, #tpu.memory_space<vmem>>, vector<1x1x32xf32>,
      %c0_121 = arith.constant 0 : index
      %c1_122 = arith.constant 1 : index
      %c0_123 = arith.constant 0 : index
      %223 = vector.load %arg21[%c0_121, %c1_122, %c0_123] : memref<1x8x32xf32, #tpu.memory_space<vmem>>, vector<1x7x32xf32>
      %224 = vector.shape_cast %223 : vector<1x7x32xf32> to vector<7x32xf32>
      %225 = vector.shape_cast %218 : vector<7x32xf32> to vector<1x7x32xf32>
      tpu.vector_store %arg21[%c0_121, %c1_122, %c0_123], %225 {strides = array<i32>} : memref<1x8x32xf32, #tpu.memory_space<vmem>>, vector<1x7x32xf32>,
    } else {
    }
    %c0 = arith.constant 0 : index
    %c0_1 = arith.constant 0 : index
    %c0_2 = arith.constant 0 : index
    %3 = vector.load %arg21[%c0, %c0_1, %c0_2] : memref<1x8x32xf32, #tpu.memory_space<vmem>>, vector<1x8x32xf32>
    %4 = vector.shape_cast %3 : vector<1x8x32xf32> to vector<8x32xf32>
    %c0_3 = arith.constant 0 : index
    %c0_4 = arith.constant 0 : index
    %c0_5 = arith.constant 0 : index
    %5 = vector.load %arg7[%c0_3, %c0_4, %c0_5] : memref<1x1x32xf32, #tpu.memory_space<vmem>>, vector<1x1x32xf32>
    %6 = vector.shape_cast %5 : vector<1x1x32xf32> to vector<1x32xf32>
    %c0_6 = arith.constant 0 : index
    %c0_7 = arith.constant 0 : index
    %c0_8 = arith.constant 0 : index
    %7 = vector.load %arg8[%c0_6, %c0_7, %c0_8] : memref<1x1x32xf32, #tpu.memory_space<vmem>>, vector<1x1x32xf32>
    %8 = vector.shape_cast %7 : vector<1x1x32xf32> to vector<1x32xf32>
    %cst = arith.constant dense<0.000000e+00> : vector<8xf32>
    %9 = vector.multi_reduction <add>, %4, %cst [1] : vector<8x32xf32> to vector<8xf32>
    %10 = vector.shape_cast %9 : vector<8xf32> to vector<8x1xf32>
    %cst_9 = arith.constant 3.200000e+01 : f32
    %11 = vector.broadcast %cst_9 : f32 to vector<8x1xf32>
    %12 = arith.divf %10, %11 : vector<8x1xf32>
    %13 = vector.broadcast %12 : vector<8x1xf32> to vector<8x32xf32>
    %14 = arith.subf %4, %13 : vector<8x32xf32>
    %15 = arith.mulf %14, %14 : vector<8x32xf32>
    %cst_10 = arith.constant dense<0.000000e+00> : vector<8xf32>
    %16 = vector.multi_reduction <add>, %15, %cst_10 [1] : vector<8x32xf32> to vector<8xf32>
    %17 = vector.shape_cast %16 : vector<8xf32> to vector<8x1xf32>
    %cst_11 = arith.constant 3.200000e+01 : f32
    %18 = vector.broadcast %cst_11 : f32 to vector<8x1xf32>
    %19 = arith.divf %17, %18 : vector<8x1xf32>
    %cst_12 = arith.constant 9.99999974E-6 : f32
    %20 = vector.broadcast %cst_12 : f32 to vector<8x1xf32>
    %21 = arith.addf %19, %20 : vector<8x1xf32>
    %22 = math.rsqrt %21 : vector<8x1xf32>
    %23 = vector.broadcast %22 : vector<8x1xf32> to vector<8x32xf32>
    %24 = arith.mulf %14, %23 : vector<8x32xf32>
    %25 = vector.broadcast %6 : vector<1x32xf32> to vector<8x32xf32>
    %26 = arith.mulf %24, %25 : vector<8x32xf32>
    %27 = vector.broadcast %8 : vector<1x32xf32> to vector<8x32xf32>
    %28 = arith.addf %26, %27 : vector<8x32xf32>
    %c0_13 = arith.constant 0 : index
    %c0_14 = arith.constant 0 : index
    %c0_15 = arith.constant 0 : index
    %29 = vector.load %arg9[%c0_13, %c0_14, %c0_15] : memref<1x32x96xf32, #tpu.memory_space<vmem>>, vector<1x32x96xf32>
    %30 = vector.shape_cast %29 : vector<1x32x96xf32> to vector<32x96xf32>
    %cst_16 = arith.constant dense<0.000000e+00> : vector<8x96xf32>
    %31 = tpu.matmul %28, %30, %cst_16 {dimension_numbers = #tpu.dot_dimension_numbers<[1], [0], [0], [1], [0, 0, 1, 1], [], []>} : vector<8x32xf32>, vector<32x96xf32>, vector<8x96xf32> -> vector<8x96xf32>
    %c0_17 = arith.constant 0 : index
    %c0_18 = arith.constant 0 : index
    %c0_19 = arith.constant 0 : index
    %32 = vector.load %arg10[%c0_17, %c0_18, %c0_19] : memref<1x1x96xf32, #tpu.memory_space<vmem>>, vector<1x1x96xf32>
    %33 = vector.shape_cast %32 : vector<1x1x96xf32> to vector<1x96xf32>
    %34 = vector.broadcast %33 : vector<1x96xf32> to vector<8x96xf32>
    %35 = arith.addf %31, %34 : vector<8x96xf32>
    %36 = vector.extract_strided_slice %35 {offsets = [0, 0], sizes = [8, 32], strides = [1, 1]} : vector<8x96xf32> to vector<8x32xf32>
    %cst_20 = arith.constant 0.353553385 : f32
    %37 = vector.broadcast %cst_20 : f32 to vector<8x32xf32>
    %38 = arith.mulf %36, %37 : vector<8x32xf32>
    %39 = vector.extract_strided_slice %35 {offsets = [0, 32], sizes = [8, 32], strides = [1, 1]} : vector<8x96xf32> to vector<8x32xf32>
    %40 = vector.extract_strided_slice %35 {offsets = [0, 64], sizes = [8, 32], strides = [1, 1]} : vector<8x96xf32> to vector<8x32xf32>
    %41 = vector.extract_strided_slice %38 {offsets = [0, 0], sizes = [8, 8], strides = [1, 1]} : vector<8x32xf32> to vector<8x8xf32>
    %42 = vector.extract_strided_slice %39 {offsets = [0, 0], sizes = [8, 8], strides = [1, 1]} : vector<8x32xf32> to vector<8x8xf32>
    %cst_21 = arith.constant dense<0.000000e+00> : vector<8x8xf32>
    %43 = tpu.matmul %41, %42, %cst_21 {dimension_numbers = #tpu.dot_dimension_numbers<[1], [1], [0], [0], [0, 0, 1, 0], [], []>} : vector<8x8xf32>, vector<8x8xf32>, vector<8x8xf32> -> vector<8x8xf32>
    %c0_22 = arith.constant 0 : index
    %c0_23 = arith.constant 0 : index
    %c0_24 = arith.constant 0 : index
    %c0_25 = arith.constant 0 : index
    %44 = vector.load %arg3[%c0_22, %c0_23, %c0_24, %c0_25] : memref<1x4x8x8xf32, #tpu.memory_space<vmem>>, vector<1x1x8x8xf32>
    %45 = vector.shape_cast %44 : vector<1x1x8x8xf32> to vector<8x8xf32>
    %46 = arith.addf %43, %45 : vector<8x8xf32>
    %cst_26 = arith.constant dense<0xFF800000> : vector<8xf32>
    %47 = vector.multi_reduction <maximumf>, %46, %cst_26 [1] : vector<8x8xf32> to vector<8xf32>
    %48 = vector.shape_cast %47 : vector<8xf32> to vector<8x1xf32>
    %49 = vector.broadcast %48 : vector<8x1xf32> to vector<8x8xf32>
    %50 = arith.subf %46, %49 : vector<8x8xf32>
    %51 = math.exp %50 : vector<8x8xf32>
    %cst_27 = arith.constant dense<0.000000e+00> : vector<8xf32>
    %52 = vector.multi_reduction <add>, %51, %cst_27 [1] : vector<8x8xf32> to vector<8xf32>
    %53 = vector.shape_cast %52 : vector<8xf32> to vector<8x1xf32>
    %54 = tpu.reciprocal %53 {approx = true} : vector<8x1xf32> -> vector<8x1xf32>
    %55 = vector.broadcast %54 : vector<8x1xf32> to vector<8x8xf32>
    %56 = arith.mulf %51, %55 : vector<8x8xf32>
    %57 = vector.extract_strided_slice %40 {offsets = [0, 0], sizes = [8, 8], strides = [1, 1]} : vector<8x32xf32> to vector<8x8xf32>
    %cst_28 = arith.constant dense<0.000000e+00> : vector<8x8xf32>
    %58 = tpu.matmul %56, %57, %cst_28 {dimension_numbers = #tpu.dot_dimension_numbers<[1], [0], [0], [1], [0, 0, 1, 1], [], []>} : vector<8x8xf32>, vector<8x8xf32>, vector<8x8xf32> -> vector<8x8xf32>
    %c0_29 = arith.constant 0 : index
    %c0_30 = arith.constant 0 : index
    %59 = vector.load %arg22[%c0_29, %c0_30] : memref<8x32xf32, #tpu.memory_space<vmem>>, vector<8x8xf32>
    tpu.vector_store %arg22[%c0_29, %c0_30], %58 {strides = array<i32>} : memref<8x32xf32, #tpu.memory_space<vmem>>, vector<8x8xf32>,
    %60 = vector.extract_strided_slice %38 {offsets = [0, 8], sizes = [8, 8], strides = [1, 1]} : vector<8x32xf32> to vector<8x8xf32>
    %61 = vector.extract_strided_slice %39 {offsets = [0, 8], sizes = [8, 8], strides = [1, 1]} : vector<8x32xf32> to vector<8x8xf32>
    %cst_31 = arith.constant dense<0.000000e+00> : vector<8x8xf32>
    %62 = tpu.matmul %60, %61, %cst_31 {dimension_numbers = #tpu.dot_dimension_numbers<[1], [1], [0], [0], [0, 0, 1, 0], [], []>} : vector<8x8xf32>, vector<8x8xf32>, vector<8x8xf32> -> vector<8x8xf32>
    %c0_32 = arith.constant 0 : index
    %c1 = arith.constant 1 : index
    %c0_33 = arith.constant 0 : index
    %c0_34 = arith.constant 0 : index
    %63 = vector.load %arg3[%c0_32, %c1, %c0_33, %c0_34] : memref<1x4x8x8xf32, #tpu.memory_space<vmem>>, vector<1x1x8x8xf32>
    %64 = vector.shape_cast %63 : vector<1x1x8x8xf32> to vector<8x8xf32>
    %65 = arith.addf %62, %64 : vector<8x8xf32>
    %cst_35 = arith.constant dense<0xFF800000> : vector<8xf32>
    %66 = vector.multi_reduction <maximumf>, %65, %cst_35 [1] : vector<8x8xf32> to vector<8xf32>
    %67 = vector.shape_cast %66 : vector<8xf32> to vector<8x1xf32>
    %68 = vector.broadcast %67 : vector<8x1xf32> to vector<8x8xf32>
    %69 = arith.subf %65, %68 : vector<8x8xf32>
    %70 = math.exp %69 : vector<8x8xf32>
    %cst_36 = arith.constant dense<0.000000e+00> : vector<8xf32>
    %71 = vector.multi_reduction <add>, %70, %cst_36 [1] : vector<8x8xf32> to vector<8xf32>
    %72 = vector.shape_cast %71 : vector<8xf32> to vector<8x1xf32>
    %73 = tpu.reciprocal %72 {approx = true} : vector<8x1xf32> -> vector<8x1xf32>
    %74 = vector.broadcast %73 : vector<8x1xf32> to vector<8x8xf32>
    %75 = arith.mulf %70, %74 : vector<8x8xf32>
    %76 = vector.extract_strided_slice %40 {offsets = [0, 8], sizes = [8, 8], strides = [1, 1]} : vector<8x32xf32> to vector<8x8xf32>
    %cst_37 = arith.constant dense<0.000000e+00> : vector<8x8xf32>
    %77 = tpu.matmul %75, %76, %cst_37 {dimension_numbers = #tpu.dot_dimension_numbers<[1], [0], [0], [1], [0, 0, 1, 1], [], []>} : vector<8x8xf32>, vector<8x8xf32>, vector<8x8xf32> -> vector<8x8xf32>
    %c0_38 = arith.constant 0 : index
    %c8 = arith.constant 8 : index
    %78 = vector.load %arg22[%c0_38, %c8] : memref<8x32xf32, #tpu.memory_space<vmem>>, vector<8x8xf32>
    tpu.vector_store %arg22[%c0_38, %c8], %77 {strides = array<i32>} : memref<8x32xf32, #tpu.memory_space<vmem>>, vector<8x8xf32>,
    %79 = vector.extract_strided_slice %38 {offsets = [0, 16], sizes = [8, 8], strides = [1, 1]} : vector<8x32xf32> to vector<8x8xf32>
    %80 = vector.extract_strided_slice %39 {offsets = [0, 16], sizes = [8, 8], strides = [1, 1]} : vector<8x32xf32> to vector<8x8xf32>
    %cst_39 = arith.constant dense<0.000000e+00> : vector<8x8xf32>
    %81 = tpu.matmul %79, %80, %cst_39 {dimension_numbers = #tpu.dot_dimension_numbers<[1], [1], [0], [0], [0, 0, 1, 0], [], []>} : vector<8x8xf32>, vector<8x8xf32>, vector<8x8xf32> -> vector<8x8xf32>
    %c0_40 = arith.constant 0 : index
    %c2 = arith.constant 2 : index
    %c0_41 = arith.constant 0 : index
    %c0_42 = arith.constant 0 : index
    %82 = vector.load %arg3[%c0_40, %c2, %c0_41, %c0_42] : memref<1x4x8x8xf32, #tpu.memory_space<vmem>>, vector<1x1x8x8xf32>
    %83 = vector.shape_cast %82 : vector<1x1x8x8xf32> to vector<8x8xf32>
    %84 = arith.addf %81, %83 : vector<8x8xf32>
    %cst_43 = arith.constant dense<0xFF800000> : vector<8xf32>
    %85 = vector.multi_reduction <maximumf>, %84, %cst_43 [1] : vector<8x8xf32> to vector<8xf32>
    %86 = vector.shape_cast %85 : vector<8xf32> to vector<8x1xf32>
    %87 = vector.broadcast %86 : vector<8x1xf32> to vector<8x8xf32>
    %88 = arith.subf %84, %87 : vector<8x8xf32>
    %89 = math.exp %88 : vector<8x8xf32>
    %cst_44 = arith.constant dense<0.000000e+00> : vector<8xf32>
    %90 = vector.multi_reduction <add>, %89, %cst_44 [1] : vector<8x8xf32> to vector<8xf32>
    %91 = vector.shape_cast %90 : vector<8xf32> to vector<8x1xf32>
    %92 = tpu.reciprocal %91 {approx = true} : vector<8x1xf32> -> vector<8x1xf32>
    %93 = vector.broadcast %92 : vector<8x1xf32> to vector<8x8xf32>
    %94 = arith.mulf %89, %93 : vector<8x8xf32>
    %95 = vector.extract_strided_slice %40 {offsets = [0, 16], sizes = [8, 8], strides = [1, 1]} : vector<8x32xf32> to vector<8x8xf32>
    %cst_45 = arith.constant dense<0.000000e+00> : vector<8x8xf32>
    %96 = tpu.matmul %94, %95, %cst_45 {dimension_numbers = #tpu.dot_dimension_numbers<[1], [0], [0], [1], [0, 0, 1, 1], [], []>} : vector<8x8xf32>, vector<8x8xf32>, vector<8x8xf32> -> vector<8x8xf32>
    %c0_46 = arith.constant 0 : index
    %c16 = arith.constant 16 : index
    %97 = vector.load %arg22[%c0_46, %c16] : memref<8x32xf32, #tpu.memory_space<vmem>>, vector<8x8xf32>
    tpu.vector_store %arg22[%c0_46, %c16], %96 {strides = array<i32>} : memref<8x32xf32, #tpu.memory_space<vmem>>, vector<8x8xf32>,
    %98 = vector.extract_strided_slice %38 {offsets = [0, 24], sizes = [8, 8], strides = [1, 1]} : vector<8x32xf32> to vector<8x8xf32>
    %99 = vector.extract_strided_slice %39 {offsets = [0, 24], sizes = [8, 8], strides = [1, 1]} : vector<8x32xf32> to vector<8x8xf32>
    %cst_47 = arith.constant dense<0.000000e+00> : vector<8x8xf32>
    %100 = tpu.matmul %98, %99, %cst_47 {dimension_numbers = #tpu.dot_dimension_numbers<[1], [1], [0], [0], [0, 0, 1, 0], [], []>} : vector<8x8xf32>, vector<8x8xf32>, vector<8x8xf32> -> vector<8x8xf32>
    %c0_48 = arith.constant 0 : index
    %c3 = arith.constant 3 : index
    %c0_49 = arith.constant 0 : index
    %c0_50 = arith.constant 0 : index
    %101 = vector.load %arg3[%c0_48, %c3, %c0_49, %c0_50] : memref<1x4x8x8xf32, #tpu.memory_space<vmem>>, vector<1x1x8x8xf32>
    %102 = vector.shape_cast %101 : vector<1x1x8x8xf32> to vector<8x8xf32>
    %103 = arith.addf %100, %102 : vector<8x8xf32>
    %cst_51 = arith.constant dense<0xFF800000> : vector<8xf32>
    %104 = vector.multi_reduction <maximumf>, %103, %cst_51 [1] : vector<8x8xf32> to vector<8xf32>
    %105 = vector.shape_cast %104 : vector<8xf32> to vector<8x1xf32>
    %106 = vector.broadcast %105 : vector<8x1xf32> to vector<8x8xf32>
    %107 = arith.subf %103, %106 : vector<8x8xf32>
    %108 = math.exp %107 : vector<8x8xf32>
    %cst_52 = arith.constant dense<0.000000e+00> : vector<8xf32>
    %109 = vector.multi_reduction <add>, %108, %cst_52 [1] : vector<8x8xf32> to vector<8xf32>
    %110 = vector.shape_cast %109 : vector<8xf32> to vector<8x1xf32>
    %111 = tpu.reciprocal %110 {approx = true} : vector<8x1xf32> -> vector<8x1xf32>
    %112 = vector.broadcast %111 : vector<8x1xf32> to vector<8x8xf32>
    %113 = arith.mulf %108, %112 : vector<8x8xf32>
    %114 = vector.extract_strided_slice %40 {offsets = [0, 24], sizes = [8, 8], strides = [1, 1]} : vector<8x32xf32> to vector<8x8xf32>
    %cst_53 = arith.constant dense<0.000000e+00> : vector<8x8xf32>
    %115 = tpu.matmul %113, %114, %cst_53 {dimension_numbers = #tpu.dot_dimension_numbers<[1], [0], [0], [1], [0, 0, 1, 1], [], []>} : vector<8x8xf32>, vector<8x8xf32>, vector<8x8xf32> -> vector<8x8xf32>
    %c0_54 = arith.constant 0 : index
    %c24 = arith.constant 24 : index
    %116 = vector.load %arg22[%c0_54, %c24] : memref<8x32xf32, #tpu.memory_space<vmem>>, vector<8x8xf32>
    tpu.vector_store %arg22[%c0_54, %c24], %115 {strides = array<i32>} : memref<8x32xf32, #tpu.memory_space<vmem>>, vector<8x8xf32>,
    %c0_55 = arith.constant 0 : index
    %c0_56 = arith.constant 0 : index
    %117 = vector.load %arg22[%c0_55, %c0_56] : memref<8x32xf32, #tpu.memory_space<vmem>>, vector<8x32xf32>
    %c0_57 = arith.constant 0 : index
    %c0_58 = arith.constant 0 : index
    %c0_59 = arith.constant 0 : index
    %118 = vector.load %arg11[%c0_57, %c0_58, %c0_59] : memref<1x32x32xf32, #tpu.memory_space<vmem>>, vector<1x32x32xf32>
    %119 = vector.shape_cast %118 : vector<1x32x32xf32> to vector<32x32xf32>
    %cst_60 = arith.constant dense<0.000000e+00> : vector<8x32xf32>
    %120 = tpu.matmul %117, %119, %cst_60 {dimension_numbers = #tpu.dot_dimension_numbers<[1], [0], [0], [1], [0, 0, 1, 1], [], []>} : vector<8x32xf32>, vector<32x32xf32>, vector<8x32xf32> -> vector<8x32xf32>
    %c0_61 = arith.constant 0 : index
    %c0_62 = arith.constant 0 : index
    %c0_63 = arith.constant 0 : index
    %121 = vector.load %arg12[%c0_61, %c0_62, %c0_63] : memref<1x1x32xf32, #tpu.memory_space<vmem>>, vector<1x1x32xf32>
    %122 = vector.shape_cast %121 : vector<1x1x32xf32> to vector<1x32xf32>
    %123 = vector.broadcast %122 : vector<1x32xf32> to vector<8x32xf32>
    %124 = arith.addf %120, %123 : vector<8x32xf32>
    %125 = arith.addf %4, %124 : vector<8x32xf32>
    %c0_64 = arith.constant 0 : index
    %c0_65 = arith.constant 0 : index
    %c0_66 = arith.constant 0 : index
    %126 = vector.load %arg13[%c0_64, %c0_65, %c0_66] : memref<1x1x32xf32, #tpu.memory_space<vmem>>, vector<1x1x32xf32>
    %127 = vector.shape_cast %126 : vector<1x1x32xf32> to vector<1x32xf32>
    %c0_67 = arith.constant 0 : index
    %c0_68 = arith.constant 0 : index
    %c0_69 = arith.constant 0 : index
    %128 = vector.load %arg14[%c0_67, %c0_68, %c0_69] : memref<1x1x32xf32, #tpu.memory_space<vmem>>, vector<1x1x32xf32>
    %129 = vector.shape_cast %128 : vector<1x1x32xf32> to vector<1x32xf32>
    %cst_70 = arith.constant dense<0.000000e+00> : vector<8xf32>
    %130 = vector.multi_reduction <add>, %125, %cst_70 [1] : vector<8x32xf32> to vector<8xf32>
    %131 = vector.shape_cast %130 : vector<8xf32> to vector<8x1xf32>
    %cst_71 = arith.constant 3.200000e+01 : f32
    %132 = vector.broadcast %cst_71 : f32 to vector<8x1xf32>
    %133 = arith.divf %131, %132 : vector<8x1xf32>
    %134 = vector.broadcast %133 : vector<8x1xf32> to vector<8x32xf32>
    %135 = arith.subf %125, %134 : vector<8x32xf32>
    %136 = arith.mulf %135, %135 : vector<8x32xf32>
    %cst_72 = arith.constant dense<0.000000e+00> : vector<8xf32>
    %137 = vector.multi_reduction <add>, %136, %cst_72 [1] : vector<8x32xf32> to vector<8xf32>
    %138 = vector.shape_cast %137 : vector<8xf32> to vector<8x1xf32>
    %cst_73 = arith.constant 3.200000e+01 : f32
    %139 = vector.broadcast %cst_73 : f32 to vector<8x1xf32>
    %140 = arith.divf %138, %139 : vector<8x1xf32>
    %cst_74 = arith.constant 9.99999974E-6 : f32
    %141 = vector.broadcast %cst_74 : f32 to vector<8x1xf32>
    %142 = arith.addf %140, %141 : vector<8x1xf32>
    %143 = math.rsqrt %142 : vector<8x1xf32>
    %144 = vector.broadcast %143 : vector<8x1xf32> to vector<8x32xf32>
    %145 = arith.mulf %135, %144 : vector<8x32xf32>
    %146 = vector.broadcast %127 : vector<1x32xf32> to vector<8x32xf32>
    %147 = arith.mulf %145, %146 : vector<8x32xf32>
    %148 = vector.broadcast %129 : vector<1x32xf32> to vector<8x32xf32>
    %149 = arith.addf %147, %148 : vector<8x32xf32>
    %c0_75 = arith.constant 0 : index
    %c0_76 = arith.constant 0 : index
    %c0_77 = arith.constant 0 : index
    %150 = vector.load %arg15[%c0_75, %c0_76, %c0_77] : memref<1x32x64xf32, #tpu.memory_space<vmem>>, vector<1x32x64xf32>
    %151 = vector.shape_cast %150 : vector<1x32x64xf32> to vector<32x64xf32>
    %cst_78 = arith.constant dense<0.000000e+00> : vector<8x64xf32>
    %152 = tpu.matmul %149, %151, %cst_78 {dimension_numbers = #tpu.dot_dimension_numbers<[1], [0], [0], [1], [0, 0, 1, 1], [], []>} : vector<8x32xf32>, vector<32x64xf32>, vector<8x64xf32> -> vector<8x64xf32>
    %c0_79 = arith.constant 0 : index
    %c0_80 = arith.constant 0 : index
    %c0_81 = arith.constant 0 : index
    %153 = vector.load %arg16[%c0_79, %c0_80, %c0_81] : memref<1x1x64xf32, #tpu.memory_space<vmem>>, vector<1x1x64xf32>
    %154 = vector.shape_cast %153 : vector<1x1x64xf32> to vector<1x64xf32>
    %155 = vector.broadcast %154 : vector<1x64xf32> to vector<8x64xf32>
    %156 = arith.addf %152, %155 : vector<8x64xf32>
    %cst_82 = arith.constant 5.000000e-01 : f32
    %157 = vector.broadcast %cst_82 : f32 to vector<8x64xf32>
    %158 = arith.mulf %157, %156 : vector<8x64xf32>
    %cst_83 = arith.constant 0.707106769 : f32
    %159 = vector.broadcast %cst_83 : f32 to vector<8x64xf32>
    %160 = arith.mulf %156, %159 : vector<8x64xf32>
    %cst_84 = arith.constant 0.000000e+00 : f32
    %161 = vector.broadcast %cst_84 : f32 to vector<8x64xf32>
    %162 = arith.cmpf oge, %160, %161 : vector<8x64xf32>
    %cst_85 = arith.constant 1.000000e+00 : f32
    %cst_86 = arith.constant -1.000000e+00 : f32
    %163 = vector.broadcast %cst_85 : f32 to vector<8x64xf32>
    %164 = vector.broadcast %cst_86 : f32 to vector<8x64xf32>
    %165 = arith.select %162, %163, %164 : vector<8x64xi1>, vector<8x64xf32>
    %166 = math.absf %160 : vector<8x64xf32>
    %cst_87 = arith.constant 0.327591091 : f32
    %167 = vector.broadcast %cst_87 : f32 to vector<8x64xf32>
    %168 = arith.mulf %167, %166 : vector<8x64xf32>
    %cst_88 = arith.constant 1.000000e+00 : f32
    %169 = vector.broadcast %cst_88 : f32 to vector<8x64xf32>
    %170 = arith.addf %169, %168 : vector<8x64xf32>
    %cst_89 = arith.constant 1.000000e+00 : f32
    %171 = vector.broadcast %cst_89 : f32 to vector<8x64xf32>
    %172 = arith.divf %171, %170 : vector<8x64xf32>
    %cst_90 = arith.constant 1.06140542 : f32
    %173 = vector.broadcast %cst_90 : f32 to vector<8x64xf32>
    %174 = arith.mulf %173, %172 : vector<8x64xf32>
    %cst_91 = arith.constant -1.45315206 : f32
    %175 = vector.broadcast %cst_91 : f32 to vector<8x64xf32>
    %176 = arith.addf %174, %175 : vector<8x64xf32>
    %177 = arith.mulf %176, %172 : vector<8x64xf32>
    %cst_92 = arith.constant 1.42141378 : f32
    %178 = vector.broadcast %cst_92 : f32 to vector<8x64xf32>
    %179 = arith.addf %177, %178 : vector<8x64xf32>
    %180 = arith.mulf %179, %172 : vector<8x64xf32>
    %cst_93 = arith.constant -0.284496725 : f32
    %181 = vector.broadcast %cst_93 : f32 to vector<8x64xf32>
    %182 = arith.addf %180, %181 : vector<8x64xf32>
    %183 = arith.mulf %182, %172 : vector<8x64xf32>
    %cst_94 = arith.constant 0.254829586 : f32
    %184 = vector.broadcast %cst_94 : f32 to vector<8x64xf32>
    %185 = arith.addf %183, %184 : vector<8x64xf32>
    %186 = arith.mulf %185, %172 : vector<8x64xf32>
    %cst_95 = arith.constant 0.000000e+00 : f32
    %187 = vector.broadcast %cst_95 : f32 to vector<8x64xf32>
    %188 = arith.subf %187, %166 : vector<8x64xf32>
    %189 = arith.mulf %188, %166 : vector<8x64xf32>
    %190 = math.exp %189 : vector<8x64xf32>
    %191 = arith.mulf %186, %190 : vector<8x64xf32>
    %cst_96 = arith.constant 1.000000e+00 : f32
    %192 = vector.broadcast %cst_96 : f32 to vector<8x64xf32>
    %193 = arith.subf %192, %191 : vector<8x64xf32>
    %194 = arith.mulf %165, %193 : vector<8x64xf32>
    %cst_97 = arith.constant 1.000000e+00 : f32
    %195 = vector.broadcast %cst_97 : f32 to vector<8x64xf32>
    %196 = arith.addf %195, %194 : vector<8x64xf32>
    %197 = arith.mulf %158, %196 : vector<8x64xf32>
    %c0_98 = arith.constant 0 : index
    %c0_99 = arith.constant 0 : index
    %c0_100 = arith.constant 0 : index
    %198 = vector.load %arg17[%c0_98, %c0_99, %c0_100] : memref<1x64x32xf32, #tpu.memory_space<vmem>>, vector<1x64x32xf32>
    %199 = vector.shape_cast %198 : vector<1x64x32xf32> to vector<64x32xf32>
    %cst_101 = arith.constant dense<0.000000e+00> : vector<8x32xf32>
    %200 = tpu.matmul %197, %199, %cst_101 {dimension_numbers = #tpu.dot_dimension_numbers<[1], [0], [0], [1], [0, 0, 1, 1], [], []>} : vector<8x64xf32>, vector<64x32xf32>, vector<8x32xf32> -> vector<8x32xf32>
    %c0_102 = arith.constant 0 : index
    %c0_103 = arith.constant 0 : index
    %c0_104 = arith.constant 0 : index
    %201 = vector.load %arg18[%c0_102, %c0_103, %c0_104] : memref<1x1x32xf32, #tpu.memory_space<vmem>>, vector<1x1x32xf32>
    %202 = vector.shape_cast %201 : vector<1x1x32xf32> to vector<1x32xf32>
    %203 = vector.broadcast %202 : vector<1x32xf32> to vector<8x32xf32>
    %204 = arith.addf %200, %203 : vector<8x32xf32>
    %205 = arith.addf %125, %204 : vector<8x32xf32>
    %c1_i32 = arith.constant 1 : i32
    %206 = arith.cmpi slt, %arg1, %c1_i32 : i32
    %207 = arith.extui %206 : i1 to i32
    %c0_i32_105 = arith.constant 0 : i32
    %208 = arith.cmpi ne, %207, %c0_i32_105 : i32
    scf.if %208 {
      %c0_108 = arith.constant 0 : index
      %c0_109 = arith.constant 0 : index
      %c0_110 = arith.constant 0 : index
      %212 = vector.load %arg21[%c0_108, %c0_109, %c0_110] : memref<1x8x32xf32, #tpu.memory_space<vmem>>, vector<1x8x32xf32>
      %213 = vector.shape_cast %212 : vector<1x8x32xf32> to vector<8x32xf32>
      %214 = vector.shape_cast %205 : vector<8x32xf32> to vector<1x8x32xf32>
      tpu.vector_store %arg21[%c0_108, %c0_109, %c0_110], %214 {strides = array<i32>} : memref<1x8x32xf32, #tpu.memory_space<vmem>>, vector<1x8x32xf32>,
    } else {
    }
    %c1_i32_106 = arith.constant 1 : i32
    %209 = arith.cmpi eq, %arg1, %c1_i32_106 : i32
    %210 = arith.extui %209 : i1 to i32
    %c0_i32_107 = arith.constant 0 : i32
    %211 = arith.cmpi ne, %210, %c0_i32_107 : i32
    scf.if %211 {
      %c0_108 = arith.constant 0 : index
      %c0_109 = arith.constant 0 : index
      %212 = vector.load %arg19[%c0_108, %c0_109] : memref<1x32xf32, #tpu.memory_space<vmem>>, vector<1x32xf32>
      %c0_110 = arith.constant 0 : index
      %c0_111 = arith.constant 0 : index
      %213 = vector.load %arg20[%c0_110, %c0_111] : memref<1x32xf32, #tpu.memory_space<vmem>>, vector<1x32xf32>
      %cst_112 = arith.constant dense<0.000000e+00> : vector<8xf32>
      %214 = vector.multi_reduction <add>, %205, %cst_112 [1] : vector<8x32xf32> to vector<8xf32>
      %215 = vector.shape_cast %214 : vector<8xf32> to vector<8x1xf32>
      %cst_113 = arith.constant 3.200000e+01 : f32
      %216 = vector.broadcast %cst_113 : f32 to vector<8x1xf32>
      %217 = arith.divf %215, %216 : vector<8x1xf32>
      %218 = vector.broadcast %217 : vector<8x1xf32> to vector<8x32xf32>
      %219 = arith.subf %205, %218 : vector<8x32xf32>
      %220 = arith.mulf %219, %219 : vector<8x32xf32>
      %cst_114 = arith.constant dense<0.000000e+00> : vector<8xf32>
      %221 = vector.multi_reduction <add>, %220, %cst_114 [1] : vector<8x32xf32> to vector<8xf32>
      %222 = vector.shape_cast %221 : vector<8xf32> to vector<8x1xf32>
      %cst_115 = arith.constant 3.200000e+01 : f32
      %223 = vector.broadcast %cst_115 : f32 to vector<8x1xf32>
      %224 = arith.divf %222, %223 : vector<8x1xf32>
      %cst_116 = arith.constant 9.99999974E-6 : f32
      %225 = vector.broadcast %cst_116 : f32 to vector<8x1xf32>
      %226 = arith.addf %224, %225 : vector<8x1xf32>
      %227 = math.rsqrt %226 : vector<8x1xf32>
      %228 = vector.broadcast %227 : vector<8x1xf32> to vector<8x32xf32>
      %229 = arith.mulf %219, %228 : vector<8x32xf32>
      %230 = vector.broadcast %212 : vector<1x32xf32> to vector<8x32xf32>
      %231 = arith.mulf %229, %230 : vector<8x32xf32>
      %232 = vector.broadcast %213 : vector<1x32xf32> to vector<8x32xf32>
      %233 = arith.addf %231, %232 : vector<8x32xf32>
      %c0_117 = arith.constant 0 : index
      %c0_118 = arith.constant 0 : index
      %c0_119 = arith.constant 0 : index
      %234 = vector.load %arg21[%c0_117, %c0_118, %c0_119] : memref<1x8x32xf32, #tpu.memory_space<vmem>>, vector<1x8x32xf32>
      %235 = vector.shape_cast %234 : vector<1x8x32xf32> to vector<8x32xf32>
      %236 = vector.shape_cast %233 : vector<8x32xf32> to vector<1x8x32xf32>
      tpu.vector_store %arg21[%c0_117, %c0_118, %c0_119], %236 {strides = array<i32>} : memref<1x8x32xf32, #tpu.memory_space<vmem>>, vector<1x8x32xf32>,
    } else {
    }
    return
  }
  func.func @transform_0(%arg0: i32, %arg1: i32) -> (i32, i32, i32) {
    %c0_i32 = arith.constant 0 : i32
    %c0_i32_0 = arith.constant 0 : i32
    %c0_i32_1 = arith.constant 0 : i32
    return %arg0, %c0_i32, %c0_i32_0 : i32, i32, i32
  }
  func.func @transform_1(%arg0: i32, %arg1: i32) -> (i32, i32, i32, i32) {
    %c0_i32 = arith.constant 0 : i32
    %c0_i32_0 = arith.constant 0 : i32
    %c0_i32_1 = arith.constant 0 : i32
    %c0_i32_2 = arith.constant 0 : i32
    return %arg0, %c0_i32, %c0_i32_0, %c0_i32_1 : i32, i32, i32, i32
  }
  func.func @transform_2(%arg0: i32, %arg1: i32) -> (i32, i32) {
    %c0_i32 = arith.constant 0 : i32
    %c0_i32_0 = arith.constant 0 : i32
    %c0_i32_1 = arith.constant 0 : i32
    return %c0_i32, %c0_i32_0 : i32, i32
  }
  func.func @transform_3(%arg0: i32, %arg1: i32) -> (i32, i32) {
    %c0_i32 = arith.constant 0 : i32
    %c0_i32_0 = arith.constant 0 : i32
    %c0_i32_1 = arith.constant 0 : i32
    return %c0_i32, %c0_i32_0 : i32, i32
  }
  func.func @transform_4(%arg0: i32, %arg1: i32) -> (i32, i32) {
    %c0_i32 = arith.constant 0 : i32
    %c0_i32_0 = arith.constant 0 : i32
    %c0_i32_1 = arith.constant 0 : i32
    return %c0_i32, %c0_i32_0 : i32, i32
  }
  func.func @transform_5(%arg0: i32, %arg1: i32) -> (i32, i32, i32) {
    %c0_i32 = arith.constant 0 : i32
    %c0_i32_0 = arith.constant 0 : i32
    %c0_i32_1 = arith.constant 0 : i32
    return %arg1, %c0_i32, %c0_i32_0 : i32, i32, i32
  }
  func.func @transform_6(%arg0: i32, %arg1: i32) -> (i32, i32, i32) {
    %c0_i32 = arith.constant 0 : i32
    %c0_i32_0 = arith.constant 0 : i32
    %c0_i32_1 = arith.constant 0 : i32
    return %arg1, %c0_i32, %c0_i32_0 : i32, i32, i32
  }
  func.func @transform_7(%arg0: i32, %arg1: i32) -> (i32, i32, i32) {
    %c0_i32 = arith.constant 0 : i32
    %c0_i32_0 = arith.constant 0 : i32
    %c0_i32_1 = arith.constant 0 : i32
    return %arg1, %c0_i32, %c0_i32_0 : i32, i32, i32
  }
  func.func @transform_8(%arg0: i32, %arg1: i32) -> (i32, i32, i32) {
    %c0_i32 = arith.constant 0 : i32
    %c0_i32_0 = arith.constant 0 : i32
    %c0_i32_1 = arith.constant 0 : i32
    return %arg1, %c0_i32, %c0_i32_0 : i32, i32, i32
  }
  func.func @transform_9(%arg0: i32, %arg1: i32) -> (i32, i32, i32) {
    %c0_i32 = arith.constant 0 : i32
    %c0_i32_0 = arith.constant 0 : i32
    %c0_i32_1 = arith.constant 0 : i32
    return %arg1, %c0_i32, %c0_i32_0 : i32, i32, i32
  }
  func.func @transform_10(%arg0: i32, %arg1: i32) -> (i32, i32, i32) {
    %c0_i32 = arith.constant 0 : i32
    %c0_i32_0 = arith.constant 0 : i32
    %c0_i32_1 = arith.constant 0 : i32
    return %arg1, %c0_i32, %c0_i32_0 : i32, i32, i32
  }
  func.func @transform_11(%arg0: i32, %arg1: i32) -> (i32, i32, i32) {
    %c0_i32 = arith.constant 0 : i32
    %c0_i32_0 = arith.constant 0 : i32
    %c0_i32_1 = arith.constant 0 : i32
    return %arg1, %c0_i32, %c0_i32_0 : i32, i32, i32
  }
  func.func @transform_12(%arg0: i32, %arg1: i32) -> (i32, i32, i32) {
    %c0_i32 = arith.constant 0 : i32
    %c0_i32_0 = arith.constant 0 : i32
    %c0_i32_1 = arith.constant 0 : i32
    return %arg1, %c0_i32, %c0_i32_0 : i32, i32, i32
  }
  func.func @transform_13(%arg0: i32, %arg1: i32) -> (i32, i32, i32) {
    %c0_i32 = arith.constant 0 : i32
    %c0_i32_0 = arith.constant 0 : i32
    %c0_i32_1 = arith.constant 0 : i32
    return %arg1, %c0_i32, %c0_i32_0 : i32, i32, i32
  }
  func.func @transform_14(%arg0: i32, %arg1: i32) -> (i32, i32, i32) {
    %c0_i32 = arith.constant 0 : i32
    %c0_i32_0 = arith.constant 0 : i32
    %c0_i32_1 = arith.constant 0 : i32
    return %arg1, %c0_i32, %c0_i32_0 : i32, i32, i32
  }
  func.func @transform_15(%arg0: i32, %arg1: i32) -> (i32, i32, i32) {
    %c0_i32 = arith.constant 0 : i32
    %c0_i32_0 = arith.constant 0 : i32
    %c0_i32_1 = arith.constant 0 : i32
    return %arg1, %c0_i32, %c0_i32_0 : i32, i32, i32
  }
  func.func @transform_16(%arg0: i32, %arg1: i32) -> (i32, i32, i32) {
    %c0_i32 = arith.constant 0 : i32
    %c0_i32_0 = arith.constant 0 : i32
    %c0_i32_1 = arith.constant 0 : i32
    return %arg1, %c0_i32, %c0_i32_0 : i32, i32, i32
  }
  func.func @transform_17(%arg0: i32, %arg1: i32) -> (i32, i32) {
    %c0_i32 = arith.constant 0 : i32
    %c0_i32_0 = arith.constant 0 : i32
    %c0_i32_1 = arith.constant 0 : i32
    return %c0_i32, %c0_i32_0 : i32, i32
  }
  func.func @transform_18(%arg0: i32, %arg1: i32) -> (i32, i32) {
    %c0_i32 = arith.constant 0 : i32
    %c0_i32_0 = arith.constant 0 : i32
    %c0_i32_1 = arith.constant 0 : i32
    return %c0_i32, %c0_i32_0 : i32, i32
  }
  func.func @transform_19(%arg0: i32, %arg1: i32) -> (i32, i32, i32) {
    %c0_i32 = arith.constant 0 : i32
    %c0_i32_0 = arith.constant 0 : i32
    %c0_i32_1 = arith.constant 0 : i32
    return %arg0, %c0_i32, %c0_i32_0 : i32, i32, i32
  }
}

</mosaic_0001>

<bundles_post_ra>
// kernel: graphormer_forward.1
= control target key start
LH: loop header
LB: loop body
LE: loop exit
PB: predicated region body
PF: predicated region fallthrough
CT: control target
= control target key end

     0   :  { %s3211_s0 = inlined_call_operand.vmem [shape: f32[2,7,9], index: 0, kind: input, shape index: {}]   ;;  %s3212_s1 = inlined_call_operand.vmem [shape: f32[2,4,8,8], index: 1, kind: input, shape index: {}]   ;;  %s3213_s2 = inlined_call_operand.vmem [shape: f32[9,32], index: 2, kind: input, shape index: {}]   ;;  %s3214_s3 = inlined_call_operand.vmem [shape: f32[1,32], index: 3, kind: input, shape index: {}]   ;;  %s3215_s4 = inlined_call_operand.vmem [shape: f32[1,32], index: 4, kind: input, shape index: {}]   ;;  %s3216_s5 = inlined_call_operand.vmem [shape: f32[2,1,32], index: 5, kind: input, shape index: {}]   ;;  %s3217_s6 = inlined_call_operand.vmem [shape: f32[2,1,32], index: 6, kind: input, shape index: {}]   ;;  %s3218_s7 = inlined_call_operand.vmem [shape: f32[2,32,96], index: 7, kind: input, shape index: {}]   ;;  %s3219_s8 = inlined_call_operand.vmem [shape: f32[2,1,96], index: 8, kind: input, shape index: {}]   ;;  %s3220_s9 = inlined_call_operand.vmem [shape: f32[2,32,32], index: 9, kind: input, shape index: {}]   ;;  %s3221_s10 = inlined_call_operand.vmem [shape: f32[2,1,32], index: 10, kind: input, shape index: {}]   ;;  %s3222_s11 = inlined_call_operand.vmem [shape: f32[2,1,32], index: 11, kind: input, shape index: {}]   ;;  %s3223_s12 = inlined_call_operand.vmem [shape: f32[2,1,32], index: 12, kind: input, shape index: {}]   ;;  %s3224_s13 = inlined_call_operand.vmem [shape: f32[2,32,64], index: 13, kind: input, shape index: {}]   ;;  %s3225_s14 = inlined_call_operand.vmem [shape: f32[2,1,64], index: 14, kind: input, shape index: {}]   ;;  %s3226_s15 = inlined_call_operand.vmem [shape: f32[2,64,32], index: 15, kind: input, shape index: {}]   ;;  %s3227_s16 = inlined_call_operand.vmem [shape: f32[2,1,32], index: 16, kind: input, shape index: {}]   ;;  %s3228_s17 = inlined_call_operand.vmem [shape: f32[1,32], index: 17, kind: input, shape index: {}]   ;;  %s3229_s18 = inlined_call_operand.vmem [shape: f32[1,32], index: 18, kind: input, shape index: {}]   ;;  %s3230_s19 = inlined_call_operand.hbm [shape: f32[2,8,32], index: 19, kind: output, shape index: {}]  }
   0x1   :  { %3247 = sst [smem:[#allocation19_spill]] %s3211_s0 }
   0x2   :  { %3248 = sst [smem:[#allocation20_spill]] %s3212_s1 }
   0x3   :  { %3249 = sst [smem:[#allocation21_spill]] %s3213_s2 }
   0x4   :  { %3250 = sst [smem:[#allocation22_spill]] %s3214_s3 }
   0x5   :  { %3251 = sst [smem:[#allocation23_spill]] %s3215_s4 }
   0x6   :  { %3252 = sst [smem:[#allocation24_spill]] %s3218_s7 }
   0x7   :  { %3253 = sst [smem:[#allocation25_spill]] %s3220_s9 }
   0x8   :  { %3254 = sst [smem:[#allocation26_spill]] %s3221_s10 }
   0x9   :  { %3255 = sst [smem:[#allocation27_spill]] %s3226_s15 }
   0xa   :  { %3256 = sst [smem:[#allocation28_spill]] %s3227_s16 }
   0xb   :  { %3257 = sst [smem:[#allocation29_spill]] %s3228_s17 }
   0xc   :  { %3258 = sst [smem:[#allocation30_spill]] %s3229_s18 }
   0xd   :  { %3259 = sst [smem:[#allocation31_spill]] %s3230_s19 }
   0xe   :  { %24 = vsyncpa [#allocation4], 0 }
   0xf   :  { %26 = vsyncpa [#allocation4 + $0x1], 0  ;;  %s2827_s0 = smov 0   ;;  %s2829_s30 = smov 0  }
  0x10   :  { %s2831_s20 = smov 0   ;;  %s2833_s21 = smov 0  }
  0x11   :  { %s2835_s1 = smov 0   ;;  %s2837_s22 = smov 0  }
  0x12   :  { %s2839_s2 = smov 0   ;;  %s2841_s23 = smov 0  }
  0x13 LB: > { %3260 = sst [smem:[#allocation6_spill]] %s2677_s0  ;;  %s2294_s24 = sadd.s32 4294967295, %s2705_s23   ;;  %s2705_s23 = sphi %s2841_s23, %s32_s23   ;;  %s2701_s2 = sphi %s2839_s2, %s3313_s2   ;;  %s2697_s22 = sphi %s2837_s22, %s3312_s22   ;;  %s2693_s1 = sphi %s2835_s1, %s3311_s1   ;;  %s2689_s21 = sphi %s2833_s21, %s3310_s21   ;;  %s2685_s20 = sphi %s2831_s20, %s3309_s20   ;;  %s2681_s30 = sphi %s2829_s30, %s3308_s30   ;;  %s2677_s0 = sphi %s2827_s0, %s3307_s0  }
  0x14   : > { %3261 = sst [smem:[#allocation7_spill]] %s2681_s30  ;;  %s2295_s25 = sadd.s32 4294967294, %s2705_s23  }
  0x15   : > { %3262 = sst [smem:[#allocation8_spill]] %s2685_s20  ;;  %s41_s3 = sadd.s32 1, %s2697_s22 }
  0x16   : > { %3263 = sst [smem:[#allocation9_spill]] %s2689_s21  ;;  %p42_p0 = scmp.ge.s32.totalorder %s41_s3, 2 }
  0x17   : > { %3264 = sst [smem:[#allocation10_spill]] %s2693_s1  ;;  %s44_s26 = sadd.s32 1, %s2701_s2 }
  0x18   : > { %3265 = sst [smem:[#allocation11_spill]] %s2697_s22  ;;  %p530_p1 = scmp.ne.s32.totalorder %s2685_s20, %s2681_s30 }
  0x19   : > { %3266 = sst [smem:[#allocation12_spill]] %s2701_s2  ;;  %p531_p2 = scmp.eq.s32.totalorder %s2294_s24, 3 }
  0x1a   : > { %3267 = sst [smem:[#allocation13_spill]] %s2705_s23  ;;  %s3315_s3 = smov (%p42_p0, %s41_s3), 0 }
  0x1b   : > { %3268 = sst [smem:[#allocation14_spill]] %s3315_s3  ;;  %s3317_s26 = smov (!%p42_p0, %s44_s26), %s2701_s2 }
  0x1c   : > { %p2876_p3 = por %p531_p2, %p530_p1  ;;  %p536_p4 = scmp.ne.s32.totalorder %s2681_s30, %s2677_s0 }
  0x1d   : > { %p46_p5 = scmp.ge.s32.totalorder %s3317_s26, 2  ;;  %p537_p6 = scmp.eq.s32.totalorder %s2295_s25, 3 }
  0x1e   : > { %s3269_s27 = scalar_select %p2876_p3, 1, 0 }
  0x1f   : > { %p2298_p7 = scmp.ge.s32.totalorder %s2705_s23, 1  ;;  %p665_p8 = scmp.lt.s32.totalorder %s2705_s23, 5 }
  0x20   : > { %3270 = sst [smem:[#allocation15_spill]] %s3269_s27  ;;  %s3319_s26 = smov (%p46_p5, %s3317_s26), 0 }
  0x21   : > { %3271 = sst [smem:[#allocation16_spill]] %s3319_s26  ;;  %p2886_p9 = por %p537_p6, %p536_p4 }
  0x22   : > { %p666_p10 = pnand %p2298_p7, %p665_p8  ;;  %s517_s29 = ssub.s32 %s2701_s2, %s3319_s26 }
  0x23   : > { %s3272_s28 = scalar_select %p2886_p9, 1, 0 }
  0x24   : > { %s520_s24 = sadd.s32 1, %s2685_s20  ;;  %p518_p11 = scmp.eq.s32.totalorder %s517_s29, 0 }
  0x25   : > { %3273 = sst [smem:[#allocation17_spill]] %s3272_s28  ;;  %669 = sbr.rel (%p666_p10) target bundleno = 3027 (0xbd3), region = 96 }
  0x26   : > { %s2894_s3 = scalar_select %p518_p11, %s2685_s20, %s520_s24  }
  0x27   : > { %s3237_s25 = sand.u32 (!%p666_p10), 1, %s2681_s30   ;;  %p769_p12 = scmp.lt.s32.totalorder (!%p666_p10), %s2693_s1, 1 }
  0x28   : > { %3274 = sst [smem:[#allocation18_spill]] %s2894_s3  ;;  %s2299_s22 = sshll.u32 (!%p666_p10), %s3237_s25, 3 }
  0x29   : > { %p778_p13 = scmp.lt.s32.totalorder (!%p666_p10), %s2689_s21, 1  ;;  %s3275_s3 = sld [smem:[#allocation19_spill]] (!%p666_p10) }
  0x2a   : > { %s770_s0 = scalar_select %p769_p12, %s2693_s1, 1 }
  0x2b   : > { %s2903_s28 = scalar_select %p778_p13, %s2689_s21, 1 }
  0x2c   : > { %s2300_s29 = sshll.u32 %s770_s0, 3  ;;  %s2350_s24 = sshll.u32 %s770_s0, 5 }
  0x2d   : > { %s3276_s19 = sld [smem:[#allocation20_spill]]  ;;  %s2351_s16 = sshll.u32 %s2903_s28, 5 }
  0x2e   : > { %s3277_s7 = sld [smem:[#allocation24_spill]]  ;;  %s2951_s18 = scalar_lea.vmem %s3224_s13, %s2351_s16 }
  0x2f   : > { %s772_s25 = scalar_lea.vmem %s3275_s3, %s2300_s29  ;;  %s3278_s9 = sld [smem:[#allocation25_spill]] }
  0x30   : > { %s3280_s4 = sld [smem:[#allocation27_spill]]  ;;  %s2967_s0 = scalar_lea.vmem [#allocation3], %s2299_s22 }
  0x31   : > { %s3281_s21 = sld [smem:[#allocation28_spill]] }
  0x32   : > { %s3282_s2 = sld [smem:[#allocation9_spill]] }
  0x33   : > { %s2911_s27 = scalar_lea.vmem %s3276_s19, %s2350_s24 }
  0x34   : > { %s2929_s29 = scalar_lea.vmem %s3277_s7, %s2351_s16  ;;  %s813_s7 = scalar_lea.vmem %s3225_s14, %s2903_s28 }
  0x35   : > { %s2934_s23 = scalar_lea.vmem %s3278_s9, %s2351_s16  ;;  %s2354_s9 = sshll.u32 %s2903_s28, 6 }
  0x36   : > { %s2961_s10 = scalar_lea.vmem %s3280_s4, %s2354_s9 }
  0x37   : > { %s821_s15 = scalar_lea.vmem %s3281_s21, %s2903_s28 }
  0x38   : > { %p2311_p0 = scmp.ne.s32.totalorder %s3282_s2, 0 }
  0x39   : > { %s3283_s3 = sld [smem:[#allocation21_spill]] (!%p2311_p0) }
  0x3a   : > { %825 = sbr.rel (%p2311_p0) target bundleno = 264 (0x108), region = 100  ;;  %s3284_s2 = sld [smem:[#allocation23_spill]] (!%p2311_p0) }
  0x3b   : > { %s3285_s30 = sld [smem:[#allocation22_spill]] (!%p2311_p0) }
  0x3f   : > { %v828_v0 = vld [vmem:[%s3283_s3 + $0x8] sm:$0x1]  ;;  %vm840_vm0 = vcmask 1040384   ;;  %v2707_v1 = vmov 0.0   ;;  %v827_v2 = vld [vmem:[%s3283_s3] sm:$0xff]  ;;  %vm2708_vm1 = vmmov 0  }
  0x40   : > { %2398 = vmatprep.subr.mxu0 %v2707_v1  ;;  %2402 = vmatprep.mubr.msk.f32.mxu0 %vm2708_vm1, %v2707_v1  ;;  %v826_v3 = vld [vmem:[%s772_s25] sm:$0x7f]  ;;  %vm836_vm2 = vcmask 72704   ;;  %vm915_vm3 = vcmask 253952   ;;  %vm917_vm4 = vcmask 260096  }
  0x41   : > { %2399 = vmatpush3.msk.msra.mxu0 %vm840_vm0, %v828_v0  ;;  %v914_v4 = vld [vmem:[%s3284_s2] sm:$0x1] }
  0x42   : > { %2400 = vmatprep.subr.mxu0 %v2707_v1  ;;  %916 = vst.msk [vmem:[%s2967_s0] sm:$0x1] %vm915_vm3, %v914_v4  ;;  %v2312_v5 = vld [vmem:[%s3285_s30] ss:$0 sm:$0xff] }
  0x43   : > { %2401 = vmatpush3.msra.mxu0 %v827_v2 }
  0x44   : > { %2403 = vmatmul.mubr.msk.f32.vlgmr.msra.gmra.mxu0 %vm836_vm2, %v826_v3 }
 0x104   : > { %v910_v6 = vpop.f32.mrf.mxu0 }
 0x105   : > { %v911_v7 = vadd.f32 %v2312_v5, %v910_v6 }
 0x106   : > { %v2404_v8 = vpop.f32.mrf.mxu0 }
 0x107   : > { %918 = vst.msk [vmem:[%s2967_s0 + $0x1] sm:$0x7f] %vm917_vm4, %v911_v7 }
 0x108 PF: > { %vm922_vm5 = vcmask 261120   ;;  %v954_v16 = vld [vmem:[%s2929_s29 + $0x18] sm:$0xff]  ;;  %v2709_v17 = vmov 0.0   ;;  %v953_v18 = vld [vmem:[%s2929_s29 + $0x10] sm:$0xff]  ;;  %vm2710_vm6 = vmmov 0   ;;  %v952_v19 = vld [vmem:[%s2929_s29 + $0x8] sm:$0xff]  ;;  %s3286_s17 = scalar_lea.vmem %s3216_s5, %s2903_s28  ;;  %s3287_s16 = scalar_lea.vmem %s3217_s6, %s2903_s28 }
 0x109   : > { %2405 = vmatprep.subr.mxu1 %v2709_v17  ;;  %2413 = vmatprep.mubr.msk.f32.mxu1 %vm2710_vm6, %v2709_v17  ;;  %v951_v20 = vld [vmem:[%s2929_s29] sm:$0xff]  ;;  %s3288_s9 = scalar_lea.vmem %s3219_s8, %s2903_s28  ;;  %s2711_s21 = smov 96   ;;  %vm1040_vm7 = vcmask 64512   ;;  %v2322_v46 = vld [vmem:[%s2911_s27 + $0x8] sm:$0xff]  ;;  %v2326_v52 = vld [vmem:[%s2911_s27 + $0x10] sm:$0xff]  ;;  %vm1375_vm8 = vcmask 130112  }
 0x10a   : > { %2406 = vmatpush3.msra.mxu1 %v954_v16  ;;  %2426 = vmatprep.subr.mxu0 %v2709_v17  ;;  %v2315_v25 = vld [vmem:[%s3286_s17] ss:$0 sm:$0xff]  ;;  %s2712_s22 = smov 120   ;;  %s2713_s2 = smov 88   ;;  %v2330_v56 = vld [vmem:[%s2911_s27 + $0x18] sm:$0xff]  ;;  %vm1548_vm9 = vcmask 195712  }
 0x10b   : > { %2407 = vmatprep.subr.mxu1 %v2709_v17  ;;  %2428 = vmatprep.mubr.msk.f32.mxu0 %vm2710_vm6, %v2709_v17  ;;  %v2316_v27 = vld [vmem:[%s3287_s16] ss:$0 sm:$0xff]  ;;  %s2714_s4 = smov 80   ;;  %s2715_s20 = smov 72   ;;  %vm1721_vm10 = vcmask 261312   ;;  %vm1964_vm12 = vcmask 523264  }
 0x10c   : > { %2408 = vmatpush3.msra.mxu1 %v953_v18  ;;  %v2317_v30 = vld [vmem:[%s3288_s9] ss:$0 sm:$0xff]  ;;  %s2716_s30 = smov 112   ;;  %s2717_s25 = smov 104  }
 0x10d   : > { %2409 = vmatprep.subr.mxu1 %v2709_v17  ;;  %v1036_v42 = vld [vmem:[%s2911_s27] sm:$0xff]  ;;  %s2718_s1 = smov 64   ;;  %s2719_s27 = smov 48  }
 0x10e   : > { %v2985_v9 = vld [vmem:[%s2967_s0] sm:$0xff]  ;;  %2410 = vmatpush3.msra.mxu1 %v952_v19  ;;  %s2720_s17 = smov 40   ;;  %s2721_s24 = smov 56  }
 0x10f   : > { %v923_v10 = vsel %vm922_vm5, %v2985_v9, 0.0  ;;  %2411 = vmatprep.subr.mxu1 %v2709_v17  ;;  %s2722_s29 = smov 8   ;;  %s2723_s16 = smov 16  }
 0x110   : > { %924 = vadd.xlane.f32.xlu0 %v923_v10  ;;  %2412 = vmatpush3.msra.mxu1 %v951_v20  ;;  %s2724_s26 = smov 24   ;;  %s3289_s9 = sld [smem:[#allocation26_spill]] }
 0x111   : > { %2416 = vmatprep.subr.mxu1 %v2709_v17 }
 0x199   : > { %v925_v11 = vpop.xlane.xlu0 %924 }
 0x19a   : > { %v927_v12 = vmul.f32 0.03125, %v925_v11 }
 0x19c   : > { %v928_v13 = vsub.f32 %v2985_v9, %v927_v12 }
 0x19e   : > { %v929_v14 = vmul.f32 %v928_v13, %v928_v13 }
 0x1a0   : > { %v930_v15 = vsel %vm922_vm5, %v929_v14, 0.0 }
 0x1a1   : > { %931 = vadd.xlane.f32.xlu0 %v930_v15 }
 0x22a   : > { %v932_v21 = vpop.xlane.xlu0 %931 }
 0x22b   : > { %v933_v22 = vmul.f32 0.03125, %v932_v21 }
 0x22d   : > { %v934_v23 = vadd.f32 1e-05, %v933_v22 }
 0x22f   : > { %2587 = vrsqrt.f32 %v934_v23 }
 0x23c   : > { %v2588_v24 = vpop.eup %2587 }
 0x23d   : > { %v936_v26 = vmul.f32 %v2588_v24, %v928_v13 }
 0x23f   : > { %v943_v28 = vmul.f32 %v2315_v25, %v936_v26 }
 0x241   : > { %v950_v29 = vadd.f32 %v2316_v27, %v943_v28 }
 0x243   : > { %2414 = vmatmul.mubr.msk.f32.vlgmr.msra.gmra.mxu1 %vm922_vm5, %v950_v29 }
 0x244   : > { %2418 = vmatprep.mubr.msk.f32.mxu1 %vm2710_vm6, %v2709_v17 }
 0x303   : > { %v1031_v31 = vpop.f32.mrf.mxu1 }
 0x304   : > { %v3023_v32 = vadd.f32 %v2317_v30, %v1031_v31 }
 0x305   : > { %v2415_v33 = vpop.f32.mrf.mxu1 }
 0x306   : > { %1038 = vrot.lane.b32.xlu1 %v3023_v32, %s2711_s21  ;;  %v1035_v34 = vmul.f32 0.35355338, %v3023_v32  ;;  %s3290_s21 = scalar_lea.vmem %s3289_s9, %s2903_s28 }
 0x308   : > { %1206 = vrot.lane.b32.xlu0 %v1035_v34, %s2712_s22 }
 0x30a   : > { %1208 = vrot.lane.b32.xlu1 %v3023_v32, %s2713_s2 }
 0x30e   : > { %1381 = vrot.lane.b32.xlu1 %v3023_v32, %s2714_s4  ;;  %s3291_s4 = scalar_lea.vmem %s3222_s11, %s2903_s28 }
 0x312   : > { %1554 = vrot.lane.b32.xlu1 %v3023_v32, %s2715_s20 }
 0x316   : > { %1379 = vrot.lane.b32.xlu1 %v1035_v34, %s2716_s30  ;;  %s3292_s30 = scalar_lea.vmem %s3223_s12, %s2903_s28 }
 0x31a   : > { %1552 = vrot.lane.b32.xlu1 %v1035_v34, %s2717_s25 }
 0x378   : > { %v1039_v35 = vpop.permute.xlu1 %1038 }
 0x379   : > { %2417 = vmatpush3.xpose.msk.msra.mxu1 %vm1040_vm7, %v1039_v35 }
 0x37a   : > { %2421 = vmatprep.subr.mxu1 %v2709_v17  ;;  %v1207_v37 = vpop.permute.xlu0 %1206 }
 0x37c   : > { %v1209_v36 = vpop.permute.xlu1 %1208  ;;  %2419 = vmatmul.mubr.msk.f32.vlgmr.msra.gmra.mxu1 %vm1040_vm7, %v1035_v34 }
 0x37d   : > { %2427 = vmatpush3.xpose.msk.msra.mxu0 %vm1040_vm7, %v1209_v36  ;;  %2423 = vmatprep.mubr.msk.f32.mxu1 %vm2710_vm6, %v2709_v17 }
 0x37e   : > { %2436 = vmatprep.subr.mxu0 %v2709_v17 }
 0x380   : > { %v1382_v38 = vpop.permute.xlu1 %1381  ;;  %2429 = vmatmul.mubr.msk.f32.vlgmr.msra.gmra.mxu0 %vm1040_vm7, %v1207_v37 }
 0x381   : > { %2437 = vmatpush3.xpose.msk.msra.mxu0 %vm1040_vm7, %v1382_v38  ;;  %2438 = vmatprep.mubr.msk.f32.mxu0 %vm2710_vm6, %v2709_v17  ;;  %v1727_v38 = vld [vmem:[%s2934_s23 + $0x18] sm:$0xff] }
 0x382   : > { %2446 = vmatprep.subr.mxu0 %v2709_v17 }
 0x384   : > { %v1555_v39 = vpop.permute.xlu1 %1554 }
 0x388   : > { %v1380_v40 = vpop.permute.xlu1 %1379 }
 0x389   : > { %2439 = vmatmul.mubr.msk.f32.vlgmr.msra.gmra.mxu0 %vm1040_vm7, %v1380_v40 }
 0x38a   : > { %2447 = vmatpush3.xpose.msk.msra.mxu0 %vm1040_vm7, %v1555_v39  ;;  %2448 = vmatprep.mubr.msk.f32.mxu0 %vm2710_vm6, %v2709_v17  ;;  %v1726_v39 = vld [vmem:[%s2934_s23 + $0x10] sm:$0xff] }
 0x38b   : > { %2456 = vmatprep.subr.mxu0 %v2709_v17 }
 0x38c   : > { %v1553_v41 = vpop.permute.xlu1 %1552 }
 0x38d   : > { %2449 = vmatmul.mubr.msk.f32.vlgmr.msra.gmra.mxu0 %vm1040_vm7, %v1553_v41  ;;  %v1725_v41 = vld [vmem:[%s2934_s23 + $0x8] sm:$0xff] }
 0x38e   : > { %2464 = vmatprep.mubr.msk.f32.mxu0 %vm2710_vm6, %v2709_v17  ;;  %2457 = vmatpush3.msra.mxu0 %v1727_v38 }
 0x38f   : > { %2458 = vmatprep.subr.mxu0 %v2709_v17 }
 0x390   : > { %2459 = vmatpush3.msra.mxu0 %v1726_v39 }
 0x391   : > { %2460 = vmatprep.subr.mxu0 %v2709_v17 }
 0x392   : > { %2461 = vmatpush3.msra.mxu0 %v1725_v41 }
 0x393   : > { %2462 = vmatprep.subr.mxu0 %v2709_v17 }
 0x43c   : > { %v1112_v43 = vpop.f32.mrf.mxu1 }
 0x43d   : > { %v1113_v44 = vadd.f32 %v1112_v43, %v1036_v42  ;;  %v1724_v43 = vld [vmem:[%s2934_s23] sm:$0xff] }
 0x43e   : > { %v2420_v45 = vpop.f32.mrf.mxu1  ;;  %2463 = vmatpush3.msra.mxu0 %v1724_v43 }
 0x43f   : > { %v1116_v47 = vsel %vm1040_vm7, %v1113_v44, -inf  ;;  %2478 = vmatprep.subr.mxu0 %v2709_v17 }
 0x440   : > { %v1280_v48 = vpop.f32.mrf.mxu0  ;;  %1117 = vmax.xlane.f32.xlu1 %v1116_v47 }
 0x441   : > { %v1281_v49 = vadd.f32 %v2322_v46, %v1280_v48 }
 0x442   : > { %v2430_v50 = vpop.f32.mrf.mxu0 }
 0x443   : > { %v1284_v51 = vsel %vm1040_vm7, %v1281_v49, -inf }
 0x444   : > { %1285 = vmax.xlane.f32.xlu0 %v1284_v51 }
 0x449   : > { %v1453_v53 = vpop.f32.mrf.mxu0 }
 0x44a   : > { %v1454_v54 = vadd.f32 %v2326_v52, %v1453_v53  ;;  %v2334_v52 = vld [vmem:[%s3290_s21] ss:$0 sm:$0xff] }
 0x44b   : > { %v2440_v55 = vpop.f32.mrf.mxu0 }
 0x44c   : > { %v1457_v57 = vsel %vm1040_vm7, %v1454_v54, -inf }
 0x44d   : > { %v1626_v58 = vpop.f32.mrf.mxu0  ;;  %1458 = vmax.xlane.f32.xlu1 %v1457_v57 }
 0x44e   : > { %v1627_v59 = vadd.f32 %v2330_v56, %v1626_v58 }
 0x44f   : > { %v2450_v60 = vpop.f32.mrf.mxu0 }
 0x450   : > { %v1630_v61 = vsel %vm1040_vm7, %v1627_v59, -inf }
 0x451   : > { %1631 = vmax.xlane.f32.xlu0 %v1630_v61 }
 0x45e   : > { %1127 = vrot.lane.b32.xlu1 %v3023_v32, %s2718_s1 }
 0x4c9   : > { %v1118_v62 = vpop.xlane.xlu1 %1117 }
 0x4ca   : > { %v1119_v63 = vsub.f32 %v1113_v44, %v1118_v62 }
 0x4cc   : > { %v1120_v0 = vmul.f32 1.442695, %v1119_v63  ;;  %v1841_v63 = vld [vmem:[%s2951_s18 + $0x18] sm:$0xff] }
 0x4cd   : > { %v1286_v1 = vpop.xlane.xlu0 %1285 }
 0x4ce   : > { %2589 = vpow2.f32 %v1120_v0  ;;  %v1287_v2 = vsub.f32 %v1281_v49, %v1286_v1  ;;  %v1840_v0 = vld [vmem:[%s2951_s18 + $0x10] sm:$0xff]  ;;  %v1838_v1 = vld [vmem:[%s2951_s18] sm:$0xff] }
 0x4d0   : > { %v1288_v3 = vmul.f32 1.442695, %v1287_v2 }
 0x4d2   : > { %2591 = vpow2.f32 %v1288_v3 }
 0x4d6   : > { %v1459_v4 = vpop.xlane.xlu1 %1458 }
 0x4d7   : > { %v1460_v5 = vsub.f32 %v1454_v54, %v1459_v4 }
 0x4d9   : > { %v1461_v6 = vmul.f32 1.442695, %v1460_v5 }
 0x4da   : > { %v1632_v7 = vpop.xlane.xlu0 %1631  ;;  %v1128_v8 = vpop.permute.xlu1 %1127 }
 0x4db   : > { %v2590_v10 = vpop.eup %2589  ;;  %2593 = vpow2.f32 %v1461_v6  ;;  %v1633_v11 = vsub.f32 %v1627_v59, %v1632_v7  ;;  %2422 = vmatpush3.msra.mxu1 %v1128_v8  ;;  %v2336_v6 = vld [vmem:[%s3291_s4] ss:$0 sm:$0xff] }
 0x4dc   : > { %v1122_v12 = vsel %vm1040_vm7, %v2590_v10, 0.0  ;;  %2431 = vmatprep.subr.mxu1 %v2709_v17  ;;  %v2337_v8 = vld [vmem:[%s3292_s30] ss:$0 sm:$0xff] }
 0x4dd   : > { %v1634_v13 = vmul.f32 1.442695, %v1633_v11  ;;  %1123 = vadd.xlane.f32.xlu1 %v1122_v12  ;;  %v1956_v12 = vld [vmem:[%s2961_s10 + $0x38] sm:$0xff] }
 0x4df   : > { %v2592_v14 = vpop.eup %2591  ;;  %2595 = vpow2.f32 %v1634_v13  ;;  %v1955_v13 = vld [vmem:[%s2961_s10 + $0x30] sm:$0xff] }
 0x4e0   : > { %v1290_v15 = vsel %vm1040_vm7, %v2592_v14, 0.0 }
 0x4e1   : > { %1291 = vadd.xlane.f32.xlu0 %v1290_v15  ;;  %v1953_v15 = vld [vmem:[%s2961_s10 + $0x20] sm:$0xff] }
 0x4e8   : > { %v2594_v16 = vpop.eup %2593 }
 0x4e9   : > { %v1463_v18 = vsel %vm1040_vm7, %v2594_v16, 0.0 }
 0x4ea   : > { %1464 = vadd.xlane.f32.xlu1 %v1463_v18  ;;  %v1951_v18 = vld [vmem:[%s2961_s10 + $0x10] sm:$0xff] }
 0x4ec   : > { %v2596_v19 = vpop.eup %2595 }
 0x4ed   : > { %v1636_v20 = vsel %vm1040_vm7, %v2596_v19, 0.0 }
 0x4ee   : > { %1637 = vadd.xlane.f32.xlu0 %v1636_v20  ;;  %v1949_v20 = vld [vmem:[%s2961_s10] sm:$0xff] }
 0x4fb   : > { %1468 = vrot.lane.b32.xlu1 %v3023_v32, %s2719_s27 }
 0x4ff   : > { %1641 = vrot.lane.b32.xlu1 %v3023_v32, %s2720_s17  ;;  %s3294_s17 = sld [smem:[#allocation9_spill]] }
 0x504   : > { %1295 = vrot.lane.b32.xlu0 %v3023_v32, %s2721_s24 }
 0x505   : > { %p2342_p1 = scmp.ge.s32.totalorder %s3294_s17, 1 }
 0x566   : > { %v1124_v21 = vpop.xlane.xlu1 %1123 }
 0x567   : > { %2597 = vrcp.f32 %v1124_v21  ;;  %v2338_v21 = vld [vmem:[%s813_s7] ss:$0 sm:$0xff] }
 0x56a   : > { %v1292_v22 = vpop.xlane.xlu0 %1291 }
 0x56b   : > { %2599 = vrcp.f32 %v1292_v22 }
 0x573   : > { %v1465_v23 = vpop.xlane.xlu1 %1464 }
 0x574   : > { %v2598_v24 = vpop.eup %2597  ;;  %2601 = vrcp.f32 %v1465_v23 }
 0x575   : > { %v1126_v25 = vmul.f32 %v2598_v24, %v2590_v10 }
 0x577   : > { %v1638_v26 = vpop.xlane.xlu0 %1637  ;;  %2424 = vmatmul.mubr.msk.f32.vlgmr.msra.gmra.mxu1 %vm1040_vm7, %v1126_v25  ;;  %v1469_v30 = vpop.permute.xlu1 %1468 }
 0x578   : > { %v2600_v27 = vpop.eup %2599  ;;  %2603 = vrcp.f32 %v1638_v26  ;;  %2433 = vmatprep.mubr.msk.f32.mxu1 %vm2710_vm6, %v2709_v17 }
 0x579   : > { %v1294_v29 = vmul.f32 %v2600_v27, %v2592_v14  ;;  %v1954_v14 = vld [vmem:[%s2961_s10 + $0x28] sm:$0xff] }
 0x57b   : > { %v1296_v28 = vpop.permute.xlu0 %1295  ;;  %v1642_v33 = vpop.permute.xlu1 %1641 }
 0x57c   : > { %2432 = vmatpush3.msra.mxu1 %v1296_v28 }
 0x57d   : > { %2434 = vmatmul.mubr.msk.f32.vlgmr.msra.gmra.mxu1 %vm1040_vm7, %v1294_v29  ;;  %2441 = vmatprep.subr.mxu1 %v2709_v17 }
 0x57e   : > { %2442 = vmatpush3.msra.mxu1 %v1469_v30  ;;  %2443 = vmatprep.mubr.msk.f32.mxu1 %vm2710_vm6, %v2709_v17 }
 0x57f   : > { %2451 = vmatprep.subr.mxu1 %v2709_v17 }
 0x581   : > { %v2602_v31 = vpop.eup %2601 }
 0x582   : > { %v1467_v32 = vmul.f32 %v2602_v31, %v2594_v16  ;;  %v1952_v16 = vld [vmem:[%s2961_s10 + $0x18] sm:$0xff] }
 0x584   : > { %2444 = vmatmul.mubr.msk.f32.vlgmr.msra.gmra.mxu1 %vm1040_vm7, %v1467_v32 }
 0x585   : > { %v2604_v34 = vpop.eup %2603  ;;  %2452 = vmatpush3.msra.mxu1 %v1642_v33  ;;  %2453 = vmatprep.mubr.msk.f32.mxu1 %vm2710_vm6, %v2709_v17 }
 0x586   : > { %v1640_v35 = vmul.f32 %v2604_v34, %v2596_v19  ;;  %2467 = vmatprep.subr.mxu1 %v2709_v17  ;;  %v1950_v19 = vld [vmem:[%s2961_s10 + $0x8] sm:$0xff] }
 0x588   : > { %2454 = vmatmul.mubr.msk.f32.vlgmr.msra.gmra.mxu1 %vm1040_vm7, %v1640_v35 }
 0x589   : > { %2475 = vmatprep.mubr.msk.f32.mxu1 %vm2710_vm6, %v2709_v17  ;;  %2468 = vmatpush3.msra.mxu1 %v1841_v63 }
 0x58a   : > { %2469 = vmatprep.subr.mxu1 %v2709_v17 }
 0x58b   : > { %2470 = vmatpush3.msra.mxu1 %v1840_v0 }
 0x58c   : > { %2471 = vmatprep.subr.mxu1 %v2709_v17 }
 0x637   : > { %v1199_v36 = vpop.f32.mrf.mxu1 }
 0x638   : > { %1203 = vst.msk [vmem:[#allocation2] sm:$0xff] %vm1040_vm7, %v1199_v36 }
 0x639   : > { %v2425_v37 = vpop.f32.mrf.mxu1 }
 0x63d   : > { %v1367_v40 = vpop.f32.mrf.mxu1 }
 0x63e   : > { %1372 = vrot.lane.b32.xlu0 %v1367_v40, %s2722_s29 }
 0x63f   : > { %v2435_v42 = vpop.f32.mrf.mxu1 }
 0x644   : > { %v1540_v44 = vpop.f32.mrf.mxu1 }
 0x645   : > { %1545 = vrot.lane.b32.xlu1 %v1540_v44, %s2723_s16  ;;  %v2725_v44 = vmov -1.0  }
 0x646   : > { %v2445_v45 = vpop.f32.mrf.mxu1 }
 0x648   : > { %v1713_v46 = vpop.f32.mrf.mxu1 }
 0x649   : > { %1718 = vrot.lane.b32.xlu0 %v1713_v46, %s2724_s26 }
 0x64a   : > { %v2455_v47 = vpop.f32.mrf.mxu1 }
 0x6b0   : > { %v1373_v48 = vpop.permute.xlu0 %1372 }
 0x6b1   : > { %1376 = vst.msk [vmem:[#allocation2] sm:$0xff] %vm1375_vm8, %v1373_v48 }
 0x6b7   : > { %v1546_v49 = vpop.permute.xlu1 %1545 }
 0x6b8   : > { %1549 = vst.msk [vmem:[#allocation2] sm:$0xff] %vm1548_vm9, %v1546_v49 }
 0x6bb   : > { %v1719_v50 = vpop.permute.xlu0 %1718 }
 0x6bc   : > { %1722 = vst.msk [vmem:[#allocation2] sm:$0xff] %vm1721_vm10, %v1719_v50  ;;  %v2340_v50 = vld [vmem:[%s821_s15] ss:$0 sm:$0xff] }
 0x6c3   : > { %v1723_v51 = vld [vmem:[#allocation2] sm:$0xff] }
 0x6c4   : > { %2465 = vmatmul.mubr.msk.f32.vlgmr.msra.gmra.mxu0 %vm922_vm5, %v1723_v51 }
 0x6c5   : > { %2494 = vmatprep.mubr.msk.f32.mxu0 %vm2710_vm6, %v2709_v17  ;;  %2479 = vmatpush3.msra.mxu0 %v1956_v12 }
 0x6c6   : > { %2480 = vmatprep.subr.mxu0 %v2709_v17 }
 0x6c7   : > { %2481 = vmatpush3.msra.mxu0 %v1955_v13 }
 0x6c8   : > { %2482 = vmatprep.subr.mxu0 %v2709_v17 }
 0x6c9   : > { %2483 = vmatpush3.msra.mxu0 %v1954_v14 }
 0x6ca   : > { %2484 = vmatprep.subr.mxu0 %v2709_v17 }
 0x6cb   : > { %2485 = vmatpush3.msra.mxu0 %v1953_v15 }
 0x6cc   : > { %2486 = vmatprep.subr.mxu0 %v2709_v17 }
 0x6cd   : > { %2487 = vmatpush3.msra.mxu0 %v1952_v16 }
 0x6ce   : > { %2488 = vmatprep.subr.mxu0 %v2709_v17 }
 0x6cf   : > { %2489 = vmatpush3.msra.mxu0 %v1951_v18 }
 0x6d0   : > { %2490 = vmatprep.subr.mxu0 %v2709_v17 }
 0x6d1   : > { %2491 = vmatpush3.msra.mxu0 %v1950_v19 }
 0x6d2   : > { %2492 = vmatprep.subr.mxu0 %v2709_v17 }
 0x6d3   : > { %2493 = vmatpush3.msra.mxu0 %v1949_v20 }
 0x784   : > { %v1804_v53 = vpop.f32.mrf.mxu0 }
 0x785   : > { %v1805_v54 = vadd.f32 %v2334_v52, %v1804_v53 }
 0x786   : > { %v2466_v55 = vpop.f32.mrf.mxu0 }
 0x787   : > { %v3100_v56 = vadd.f32 %v1805_v54, %v2985_v9  ;;  %v1839_v9 = vld [vmem:[%s2951_s18 + $0x8] sm:$0xff] }
 0x788   : > { %2472 = vmatpush3.msra.mxu1 %v1839_v9 }
 0x789   : > { %v1811_v57 = vsel %vm922_vm5, %v3100_v56, 0.0  ;;  %2473 = vmatprep.subr.mxu1 %v2709_v17 }
 0x78a   : > { %1812 = vadd.xlane.f32.xlu1 %v1811_v57  ;;  %2474 = vmatpush3.msra.mxu1 %v1838_v1 }
 0x813   : > { %v1813_v58 = vpop.xlane.xlu1 %1812 }
 0x814   : > { %v1814_v59 = vmul.f32 0.03125, %v1813_v58 }
 0x816   : > { %v1815_v60 = vsub.f32 %v3100_v56, %v1814_v59 }
 0x818   : > { %v1816_v61 = vmul.f32 %v1815_v60, %v1815_v60 }
 0x81a   : > { %v1817_v62 = vsel %vm922_vm5, %v1816_v61, 0.0 }
 0x81b   : > { %1818 = vadd.xlane.f32.xlu0 %v1817_v62 }
 0x8a4   : > { %v1819_v2 = vpop.xlane.xlu0 %1818 }
 0x8a5   : > { %v1820_v3 = vmul.f32 0.03125, %v1819_v2 }
 0x8a7   : > { %v1821_v4 = vadd.f32 1e-05, %v1820_v3 }
 0x8a9   : > { %2605 = vrsqrt.f32 %v1821_v4 }
 0x8b6   : > { %v2606_v5 = vpop.eup %2605 }
 0x8b7   : > { %v1823_v7 = vmul.f32 %v2606_v5, %v1815_v60 }
 0x8b9   : > { %v1830_v10 = vmul.f32 %v2336_v6, %v1823_v7 }
 0x8bb   : > { %v1837_v11 = vadd.f32 %v2337_v8, %v1830_v10 }
 0x8bd   : > { %2476 = vmatmul.mubr.msk.f32.vlgmr.msra.gmra.mxu1 %vm922_vm5, %v1837_v11 }
 0x97d   : > { %v1918_v22 = vpop.f32.mrf.mxu1 }
 0x97e   : > { %v1919_v23 = vadd.f32 %v2338_v21, %v1918_v22 }
 0x97f   : > { %v2477_v24 = vpop.f32.mrf.mxu1 }
 0x980   : > { %v1923_v25 = vmul.f32 0.70710677, %v1919_v23  ;;  %v1922_v47 = vmul.f32 0.5, %v1919_v23 }
 0x982   : > { %v1926_v26 = vand.u32 2147483647, %v1923_v25  ;;  %vm1924_vm11 = vcmp.ge.f32.partialorder %v1923_v25, 0.0 }
 0x983   : > { %v1925_v45 = vsel %vm1924_vm11, 1.0, %v2725_v44 }
 0x984   : > { %v1927_v27 = vmul.f32 0.3275911, %v1926_v26  ;;  %v1940_v29 = vsub.f32 0.0, %v1926_v26 }
 0x986   : > { %v1928_v28 = vadd.f32 1.0, %v1927_v27  ;;  %v1941_v30 = vmul.f32 %v1940_v29, %v1926_v26 }
 0x988   : > { %2607 = vrcp.f32 %v1928_v28  ;;  %v1942_v33 = vmul.f32 1.442695, %v1941_v30 }
 0x98a   : > { %2609 = vpow2.f32 %v1942_v33 }
 0x995   : > { %v2608_v31 = vpop.eup %2607 }
 0x996   : > { %v1931_v32 = vmul.f32 1.0614054, %v2608_v31 }
 0x997   : > { %v2610_v41 = vpop.eup %2609 }
 0x998   : > { %v1932_v17 = vadd.f32 -1.4531521, %v1931_v32 }
 0x99a   : > { %v1933_v34 = vmul.f32 %v2608_v31, %v1932_v17 }
 0x99c   : > { %v1934_v35 = vadd.f32 1.4214138, %v1933_v34 }
 0x99e   : > { %v1935_v36 = vmul.f32 %v2608_v31, %v1934_v35 }
 0x9a0   : > { %v1936_v37 = vadd.f32 -0.28449672, %v1935_v36 }
 0x9a2   : > { %v1937_v38 = vmul.f32 %v2608_v31, %v1936_v37 }
 0x9a4   : > { %v1938_v39 = vadd.f32 0.2548296, %v1937_v38 }
 0x9a6   : > { %v1939_v40 = vmul.f32 %v2608_v31, %v1938_v39 }
 0x9a8   : > { %v1944_v42 = vmul.f32 %v2610_v41, %v1939_v40 }
 0x9aa   : > { %v1945_v43 = vsub.f32 1.0, %v1944_v42 }
 0x9ac   : > { %v1946_v46 = vmul.f32 %v1945_v43, %v1925_v45 }
 0x9ae   : > { %v1947_v48 = vadd.f32 1.0, %v1946_v46 }
 0x9b0   : > { %v1948_v49 = vmul.f32 %v1947_v48, %v1922_v47 }
 0x9b2   : > { %2495 = vmatmul.mubr.msk.f32.vlgmr.msra.gmra.mxu0 %vm1964_vm12, %v1948_v49 }
 0xa71   : > { %2042 = sbr.rel (%p2342_p1) target bundleno = 2680 (0xa78), region = 104 }
 0xa72   : > { %v2034_v51 = vpop.f32.mrf.mxu0 }
 0xa73   : > { %v2035_v52 = vadd.f32 %v2340_v50, %v2034_v51 }
 0xa74   : > { %v2496_v53 = vpop.f32.mrf.mxu0 }
 0xa75   : > { %v2038_v54 = vadd.f32 %v2035_v52, %v3100_v56 }
 0xa77   : > { %2043 = vst.msk [vmem:[%s2967_s0] sm:$0xff] %vm922_vm5, %v2038_v54 }
 0xa78 PF: > { %s3295_s24 = sld [smem:[#allocation9_spill]] }
 0xa7e   : > { %p2343_p2 = scmp.ne.s32.totalorder %s3295_s24, 1 }
 0xa7f   : > { %s3296_s29 = sld [smem:[#allocation29_spill]] (!%p2343_p2) }
 0xa80   : > { %2047 = sbr.rel (%p2343_p2) target bundleno = 3002 (0xbba), region = 108  ;;  %s3297_s23 = sld [smem:[#allocation30_spill]] (!%p2343_p2) }
 0xa85   : > { %v2050_v55 = vsel %vm922_vm5, %v2038_v54, 0.0  ;;  %v2344_v9 = vld [vmem:[%s3296_s29] ss:$0 sm:$0xff] }
 0xa86   : > { %2051 = vadd.xlane.f32.xlu0 %v2050_v55  ;;  %v2345_v2 = vld [vmem:[%s3297_s23] ss:$0 sm:$0xff] }
 0xb0f   : > { %v2052_v57 = vpop.xlane.xlu0 %2051 }
 0xb10   : > { %v2053_v58 = vmul.f32 0.03125, %v2052_v57 }
 0xb12   : > { %v2054_v59 = vsub.f32 %v2038_v54, %v2053_v58 }
 0xb14   : > { %v2055_v60 = vmul.f32 %v2054_v59, %v2054_v59 }
 0xb16   : > { %v2056_v56 = vsel %vm922_vm5, %v2055_v60, 0.0 }
 0xb17   : > { %2057 = vadd.xlane.f32.xlu0 %v2056_v56 }
 0xba0   : > { %v2058_v61 = vpop.xlane.xlu0 %2057 }
 0xba1   : > { %v2059_v62 = vmul.f32 0.03125, %v2058_v61 }
 0xba3   : > { %v2060_v63 = vadd.f32 1e-05, %v2059_v62 }
 0xba5   : > { %2611 = vrsqrt.f32 %v2060_v63 }
 0xbb2   : > { %v2612_v0 = vpop.eup %2611 }
 0xbb3   : > { %v2062_v1 = vmul.f32 %v2612_v0, %v2054_v59 }
 0xbb5   : > { %v2069_v3 = vmul.f32 %v2344_v9, %v2062_v1 }
 0xbb7   : > { %v2076_v4 = vadd.f32 %v2345_v2, %v2069_v3 }
 0xbb9   : > { %2077 = vst.msk [vmem:[%s2967_s0] sm:$0xff] %vm922_vm5, %v2076_v4 }
 0xbba PF: > { %s3298_s19 = sld [smem:[#allocation10_spill]]  ;;  %s2092_s25 = sshll.u32 %s2967_s0, 4  ;;  %s2093_s25 = int_to_ptr.vmem [resolvable:$true] %s2092_s25 }
 0xbbb   : > { %s3299_s9 = sld [smem:[#allocation7_spill]]  ;;  %s2613_s10 = scalar_lea.vmem %s2093_s25, 128 }
 0xbbc   : > { %s3301_s20 = sld [smem:[#allocation31_spill]]  ;;  %p2614_p4 = scmp.ne.s32.totalorder %s2093_s25, %s2613_s10 }
 0xbbd   : > { %s2726_s27 = smov [#allocation3]  }
 0xbbe   : > { %p2615_p5 = pnand %p2614_p4, %p2876_p3  ;;  %s2617_s17 = sshll.u32 %s2726_s27, 4  ;;  %s2618_s17 = int_to_ptr.vmem [resolvable:$false] %s2617_s17 }
 0xbbf   : > { %s2619_s24 = scalar_lea.vmem %s2618_s17, 256  ;;  %p2620_p7 = scmp.lt.s32.totalorder %s2093_s25, %s2618_s17 }
 0xbc0   : > { %s2347_s22 = sshll.u32 %s3298_s19, 7  ;;  %p2616_p6 = pneg %p2615_p5 }
 0xbc1   : > { %s3303_s1 = sand.u32 1, %s3299_s9   ;;  %p2621_p8 = scmp.lt.s32.totalorder %s2619_s24, %s2613_s10 }
 0xbc2   : > { %s3302_s18 = smov %s3301_s20  ;;  %s2090_s30 = scalar_lea.hbm %s3301_s20, %s2347_s22 }
 0xbc3   : > { %s2079_s7 = scalar_lea.sflag [#allocation4], %s3303_s1  ;;  %p2622_p10 = por %p2621_p8, %p2620_p7 }
 0xbc5   : > { %p2623_p11 = pnand %p2622_p10, %p2616_p6 }
 0xbc7   : > { %2626 = shalt.err (!%p2623_p11)
}
 0xbc8   : > { %s2627_s28 = scalar_lea.hbm %s2090_s30, 128  ;;  %s2631_s29 = scalar_lea.hbm %s3302_s18, 256 }
 0xbc9   : > { %p2628_p12 = scmp.ne.s32.totalorder %s2090_s30, %s2627_s28  ;;  %p2632_p1 = scmp.lt.s32.totalorder %s2090_s30, %s3302_s18 }
 0xbca   : > { %p2633_p2 = scmp.lt.s32.totalorder %s2631_s29, %s2627_s28 }
 0xbcb   : > { %p2629_p13 = pnand %p2628_p12, %p2876_p3 }
 0xbcc   : > { %p2634_p4 = por %p2633_p2, %p2632_p1 }
 0xbcd   : > { %p2630_p0 = pneg %p2629_p13 }
 0xbcf   : > { %p2635_p5 = pnand %p2634_p4, %p2630_p0 }
 0xbd1   : > { %2638 = shalt.err (!%p2635_p5)
}
 0xbd2   : > { %2497 = dma.vmem_to_hbm [thread:$0]  (%p2876_p3), %s2093_s25, 128, %s2090_s30, %s2079_s7  }
 0xbd3 PF: > { %s3304_s23 = sld [smem:[#allocation13_spill]] }
 0xbd4   : > { %s3305_s19 = sld [smem:[#allocation6_spill]] }
 0xbd9   : > { %p2503_p6 = scmp.ge.s32.totalorder %s3304_s23, 2 }
 0xbda   : > { %s2104_s22 = sand.u32 1, %s3305_s19  }
 0xbdb   : > { %p2500_p7 = pnand %p2503_p6, %p2886_p9  ;;  %s2105_s2 = scalar_lea.sflag [#allocation4], %s2104_s22 }
 0xbdd   : > { %p2501_p8 = pneg %p2500_p7 }
 0xbdf   : > { %2672 = dma.done.wait (%p2501_p8), %s2105_s2, 128  }
 0xbe0   : > { %2674 = vsyncadd (%p2501_p8), %s2105_s2, 4294967168  ;;  %s32_s23 = sadd.s32 1, %s3304_s23   ;;  %s3307_s0 = sld [smem:[#allocation7_spill]] }
 0xbe1   : > { %p29_p10 = scmp.ge.s32.totalorder %s32_s23, 6   ;;  %s3308_s30 = sld [smem:[#allocation8_spill]] }
 0xbe2   : > { %s3309_s20 = sld [smem:[#allocation18_spill]] }
 0xbe3   : > { %s3310_s21 = sld [smem:[#allocation11_spill]]  ;;  %31 = sbr.rel (!%p29_p10) target bundleno = 19 (0x13), region = 185 }
 0xbe4   : > { %s3311_s1 = sld [smem:[#allocation12_spill]] }
 0xbe5   : > { %s3312_s22 = sld [smem:[#allocation14_spill]] }
 0xbe6   : > { %s3313_s2 = sld [smem:[#allocation16_spill]] }
 0xbe8   :  { %2110 = vsyncpa [#allocation4], 1 }
 0xbe9   :  { %2112 = vsyncpa [#allocation4 + $0x1], 1 }

</bundles_post_ra>
